<compile_context>
chip_gen: v5e
topology: v5e:2x2
jax: 0.10.0
libtpu: 0.0.40
codegen_flags: <defaults>
</compile_context>

<pallas_src>
import functools
import numpy as np
import jax
import jax.numpy as jnp
from jax import lax
from jax.experimental import pallas as pl
from jax.experimental.pallas import tpu as pltpu

EPS = 1e-5  # PyTorch BatchNorm2d default eps


# -----------------------------------------------------------------------------
# The single fused kernel.  grid = (phase, batch); phase 0: attention + conv1,
# phase 1: BN1 + conv2, phase 2: BN2 + sigmoid + conv_mask + identity multiply.
# Activations are held in "plane-block" layout (h sublanes, channel-blocks of w lanes).
# -----------------------------------------------------------------------------
def _axis_attention_kernel(
    xq_ref, xk_ref, xpb_ref,
    aq_ref, bk_ref,
    wf1_ref, b1_ref, g1_ref, be1_ref,
    wf2_ref, b2_ref, g2_ref, be2_ref,
    wmk_ref, bsum_ref,
    out_ref,
    act_ref, stats_ref,
    *, b, c, h, w):
  f32 = jnp.float32
  bf16 = jnp.bfloat16
  cw = c * w
  phase = pl.program_id(0)
  bi = pl.program_id(1)
  n_inv = 1.0 / float(b * h * w)

  def conv3x3_relu(xin_bf, wf_ref, brow, cin):
    """3x3 / pad=1 conv + bias + ReLU on (h, cin*w) plane-block activations.
    3 masked lane-shift variants (dx) + 3 sublane shifts (dy) each; all 9 taps
    fused into ONE MXU matmul against a host-built (9*cin*w, cout*w) block weight."""
    n = cin * w
    lane = lax.broadcasted_iota(jnp.int32, (1, n), 1)
    col = (lane & (w - 1)) if (w & (w - 1)) == 0 else (lane % w)
    left_ok = jnp.where(col >= 1, 1.0, 0.0).astype(bf16)      # tap reads column wo-1
    right_ok = jnp.where(col <= w - 2, 1.0, 0.0).astype(bf16)  # tap reads column wo+1
    zcol = jnp.zeros((h, 1), bf16)
    zrow = jnp.zeros((1, n), bf16)
    views = []
    for dx in (-1, 0, 1):                       # order must match host weight fusion
      if dx == -1:
        vx = jnp.concatenate([zcol, xin_bf[:, : n - 1]], axis=1) * left_ok
      elif dx == 1:
        vx = jnp.concatenate([xin_bf[:, 1:], zcol], axis=1) * right_ok
      else:
        vx = xin_bf
      for dy in (-1, 0, 1):
        if dy == -1:
          v = jnp.concatenate([zrow, vx[: h - 1, :]], axis=0)
        elif dy == 1:
          v = jnp.concatenate([vx[1:, :], zrow], axis=0)
        else:
          v = vx
        views.append(v)
    x9 = jnp.concatenate(views, axis=1)                        # (h, 9*cin*w) bf16
    y = jnp.dot(x9, wf_ref[...], preferred_element_type=f32) + brow
    return jnp.maximum(y, 0.0)

  def colstats(y):
    return jnp.concatenate(
        [jnp.sum(y, axis=0, keepdims=True),
         jnp.sum(y * y, axis=0, keepdims=True)], axis=0)       # (2, cw) f32

  def bn_apply(y, stat_rows, grow, berow):
    # per-channel batch stats; block-sum over the w lanes of each channel via a
    # tiny kron(I_c, ones(w,w)) matmul, kept in f32 for accuracy.
    blk = jnp.dot(stat_rows, bsum_ref[...], preferred_element_type=f32)   # (2, cw)
    mean = blk[0:1, :] * n_inv
    var = blk[1:2, :] * n_inv - mean * mean
    scale = grow * lax.rsqrt(var + EPS)
    return (y - mean) * scale + berow

  @pl.when(phase == 0)
  def _stage0():
    @pl.when(bi == 0)
    def _():
      stats_ref[...] = jnp.zeros_like(stats_ref)

    # conv_q / conv_k (1x1) absorbed into kron-structured matrices applied to the
    # host-side contiguous reshapes of x (both axes + the pre-permuted value operand
    # of the w branch share one matmul each).
    qall = jnp.dot(aq_ref[...], xq_ref[0], preferred_element_type=f32)   # (h, 3*cw)
    kall = jnp.dot(bk_ref[...], xk_ref[0], preferred_element_type=f32)   # (c*h, 2*w)
    q_h, q_w, qv_w = qall[:, :cw], qall[:, cw:2 * cw], qall[:, 2 * cw:]
    k_h, k_w = kall[:, :w], kall[:, w:]

    def axis_attention(qm, km, vm):
      s = jnp.dot(qm.astype(bf16), km.astype(bf16), preferred_element_type=f32)
      e = jnp.exp(s - jnp.max(s, axis=0, keepdims=True))       # torch Softmax(dim=1)
      p_ = e / jnp.sum(e, axis=0, keepdims=True)               # exact normalization
      return jnp.dot(p_.astype(bf16), vm.astype(bf16), preferred_element_type=f32)

    a_h = axis_attention(q_h, k_h, q_h)    # (h, c*w): channel ci in lanes [ci*w, ci*w+w)
    a_w = axis_attention(q_w, k_w, qv_w)   # same layout thanks to host-side column perm
    xcat = jnp.concatenate([a_h, a_w], axis=1).astype(bf16)    # (h, 2c*w)

    y1 = conv3x3_relu(xcat, wf1_ref, b1_ref[...], 2 * c)       # (h, c*w) f32
    act_ref[bi] = y1
    stats_ref[0] = stats_ref[0] + colstats(y1)

  @pl.when(phase == 1)
  def _stage1():
    @pl.when(bi == 0)
    def _():
      stats_ref[1] = jnp.zeros((2, cw), f32)
    y1 = bn_apply(act_ref[bi], stats_ref[0], g1_ref[...], be1_ref[...])
    y2 = conv3x3_relu(y1.astype(bf16), wf2_ref, b2_ref[...], c)
    act_ref[bi] = y2
    stats_ref[1] = stats_ref[1] + colstats(y2)

  @pl.when(phase == 2)
  def _stage2():
    y2 = bn_apply(act_ref[bi], stats_ref[1], g2_ref[...], be2_ref[...])
    sig = 0.5 * (jnp.tanh(0.5 * y2) + 1.0)                     # exact, overflow-safe sigmoid
    m = jnp.dot(sig.astype(bf16), wmk_ref[...], preferred_element_type=f32)  # 1x1 conv_mask
    out_ref[0] = xpb_ref[0] * m                                # identity * mask


# -----------------------------------------------------------------------------
# Host wrapper: all layout scrambles and weight restructuring happen here.
# -----------------------------------------------------------------------------
def _fused_conv_weight(wconv, w, eye_w):
  """(Cout, Cin, 3, 3) conv weight -> (9*Cin*w, Cout*w) block matrix acting on the
  lane-concat of the 9 shifted plane-block views (tap order matches the kernel)."""
  blocks = []
  for dx in (-1, 0, 1):
    for dy in (-1, 0, 1):
      tap = wconv[:, :, dy + 1, dx + 1]              # (Cout, Cin)
      blocks.append(jnp.kron(tap.T, eye_w))          # (Cin*w, Cout*w)
  return jnp.concatenate(blocks, axis=0)


@jax.jit
def axis_attention_forward(x, p):
  b, c, h, w = x.shape
  cw = c * w
  assert h == w and h % c == 0, "Pallas AxisAttention expects h == w and h % c == 0"
  f32, bf16 = jnp.float32, jnp.bfloat16
  eye_w = jnp.eye(w, dtype=f32)

  # 1x1 convs absorbed into kron-structured matrices (no O(HW^2) constants).
  aq = jnp.kron(p["wq"], jnp.eye(h // c, dtype=f32)).astype(bf16)      # (h, h)
  bk = jnp.kron(p["wk"], jnp.eye(h, dtype=f32)).astype(bf16)           # (c*h, c*h)
  wmk = jnp.kron(p["wmask"].T, eye_w).astype(bf16)                     # (c*w, c*w)
  bsum = jnp.kron(jnp.eye(c, dtype=f32), jnp.ones((w, w), f32))        # (c*w, c*w)
  wf1 = _fused_conv_weight(p["w1"], w, eye_w).astype(bf16)             # (9*2c*w, c*w)
  wf2 = _fused_conv_weight(p["w2"], w, eye_w).astype(bf16)             # (9*c*w, c*w)

  def lane_rep(v):                                                     # (c,) -> (1, c*w)
    return jnp.repeat(v.astype(f32), w)[None, :]
  b1r, g1r, be1r = lane_rep(p["b1"]), lane_rep(p["g1"]), lane_rep(p["be1"])
  b2r, g2r, be2r = lane_rep(p["b2"]), lane_rep(p["g2"]), lane_rep(p["be2"])

  # Host-side layout prep: every torch .view/.permute (contiguous-reshape semantics,
  # same as reference_forward) is applied to x here, never inside the kernel.
  xt = jnp.transpose(x, (0, 1, 3, 2))                                  # per-channel transpose
  xfh = x.reshape(b, h, c * w)                                         # fold for x_h_q
  xfw = xt.reshape(b, w, c * h)                                        # fold for x_w_q
  perm = np.reshape(c * np.arange(w)[None, :] + np.arange(c)[:, None], (-1,))
  xfwp = xfw[:, :, perm]                    # pre-permuted value operand of the w branch
  xq_all = jnp.concatenate([xfh, xfw, xfwp], axis=2).astype(bf16)      # (b, h, 3*c*w)
  xk_all = jnp.concatenate([x.reshape(b, c * h, w),
                            xt.reshape(b, c * w, h)], axis=2).astype(bf16)  # (b, c*h, 2*w)
  xpb = jnp.transpose(x, (0, 2, 1, 3)).reshape(b, h, c * w)            # identity, plane-block

  inputs = (xq_all, xk_all, xpb, aq, bk,
            wf1, b1r, g1r, be1r, wf2, b2r, g2r, be2r, wmk, bsum)

  def per_batch_spec(a):
    return pl.BlockSpec((1,) + a.shape[1:], lambda ph, i: (i, 0, 0))

  def shared_spec(a):
    nd = a.ndim
    return pl.BlockSpec(a.shape, lambda ph, i: (0,) * nd)

  in_specs = [per_batch_spec(xq_all), per_batch_spec(xk_all), per_batch_spec(xpb)]
  in_specs += [shared_spec(a) for a in inputs[3:]]

  out = pl.pallas_call(
      functools.partial(_axis_attention_kernel, b=b, c=c, h=h, w=w),
      out_shape=jax.ShapeDtypeStruct((b, h, c * w), f32),
      grid=(3, b),   # (phase, batch): phases serialize the batch-coupled BatchNorms
      in_specs=in_specs,
      out_specs=pl.BlockSpec((1, h, c * w), lambda ph, i: (i, 0, 0)),
      scratch_shapes=[
          pltpu.VMEM((b, h, c * w), f32),     # stage activations (t1, then t2)
          pltpu.VMEM((2, 2, c * w), f32),     # BN1 / BN2 sum & sum-of-squares
      ],
      compiler_params=pltpu.CompilerParams(
          dimension_semantics=("arbitrary", "arbitrary"),
          vmem_limit_bytes=32 * 1024 * 1024),
  )(*inputs)

  # plane-block (b, h, c*w) -> NCHW
  return out.reshape(b, h, c, w).transpose(0, 2, 1, 3)


# -----------------------------------------------------------------------------
# Pure-JAX reference (defines the semantics; training-mode BN batch statistics)
# -----------------------------------------------------------------------------
def reference_forward(x, p):
  b, c, h, w = x.shape
  q = jnp.einsum("oi,bihw->bohw", p["wq"], x)
  k = jnp.einsum("oi,bihw->bohw", p["wk"], x)
  x_h_q = q.reshape(b, h, c * w)
  x_h_k = k.reshape(b, c * w, h)
  x_w_q = jnp.transpose(q, (0, 1, 3, 2)).reshape(b, w, c * h)
  x_w_k = jnp.transpose(k, (0, 1, 3, 2)).reshape(b, c * h, w)

  def smax1(s):
    e = jnp.exp(s - jnp.max(s, axis=1, keepdims=True))
    return e / jnp.sum(e, axis=1, keepdims=True)

  h_qkv = jnp.einsum("bnm,bmd->bnd", smax1(jnp.einsum("bnd,bdm->bnm", x_h_q, x_h_k)), x_h_q)
  w_qkv = jnp.einsum("bnm,bmd->bnd", smax1(jnp.einsum("bnd,bdm->bnm", x_w_q, x_w_k)), x_w_q)
  w_qkv = jnp.transpose(w_qkv, (0, 2, 1))
  h_qkv = h_qkv.reshape(b, h, c, w).transpose(0, 2, 1, 3)
  w_qkv = w_qkv.reshape(b, w, c, h).transpose(0, 2, 3, 1)
  xc = jnp.concatenate([h_qkv, w_qkv], axis=1)

  def conv3(xin, W, bias):
    y = lax.conv_general_dilated(xin, W, (1, 1), ((1, 1), (1, 1)),
                                 dimension_numbers=("NCHW", "OIHW", "NCHW"))
    return y + bias[None, :, None, None]

  def bn(t, g, be):
    m = jnp.mean(t, axis=(0, 2, 3), keepdims=True)
    v = jnp.mean((t - m) ** 2, axis=(0, 2, 3), keepdims=True)
    return (t - m) / jnp.sqrt(v + EPS) * g[None, :, None, None] + be[None, :, None, None]

  y1 = bn(jnp.maximum(conv3(xc, p["w1"], p["b1"]), 0.0), p["g1"], p["be1"])
  y2 = bn(jnp.maximum(conv3(y1, p["w2"], p["b2"]), 0.0), p["g2"], p["be2"])
  s = 1.0 / (1.0 + jnp.exp(-y2))
  m = jnp.einsum("oi,bihw->bohw", p["wmask"], s)
  return x * m


def init_params(key, c):
  ks = jax.random.split(key, 8)
  scale = 0.1
  return {
      "wq": scale * jax.random.normal(ks[0], (c, c), jnp.float32),
      "wk": scale * jax.random.normal(ks[1], (c, c), jnp.float32),
      "w1": scale * jax.random.normal(ks[2], (c, 2 * c, 3, 3), jnp.float32),
      "b1": scale * jax.random.normal(ks[3], (c,), jnp.float32),
      "g1": jnp.ones((c,), jnp.float32),
      "be1": jnp.zeros((c,), jnp.float32),
      "w2": scale * jax.random.normal(ks[4], (c, c, 3, 3), jnp.float32),
      "b2": scale * jax.random.normal(ks[5], (c,), jnp.float32),
      "g2": jnp.ones((c,), jnp.float32),
      "be2": jnp.zeros((c,), jnp.float32),
      "wmask": scale * jax.random.normal(ks[6], (c, c), jnp.float32),
  }


if __name__ == "__main__":
  key = jax.random.PRNGKey(0)
  kx, kp = jax.random.split(key)
  b, c, h, w = 2, 4, 16, 16
  x = jax.random.normal(kx, (b, c, h, w), jnp.float32)
  params = init_params(kp, c)

  out = jax.block_until_ready(axis_attention_forward(x, params))
  ref = reference_forward(x, params)
  err = float(jnp.max(jnp.abs(out - ref)))
  assert out.shape == (b, c, h, w), out.shape
  assert err < 5e-2, f"mismatch vs reference: max abs err = {err}"
  print("KERNEL_OK")
</pallas_src>

<mosaic_0001>
module attributes {stable_mosaic.version = 11 : i64} {
  func.func @_axis_attention_kernel(%arg0: i32, %arg1: i32, %arg2: memref<1x16x192xbf16, #tpu.memory_space<vmem>>, %arg3: memref<1x64x32xbf16, #tpu.memory_space<vmem>>, %arg4: memref<1x16x64xf32, #tpu.memory_space<vmem>>, %arg5: memref<16x16xbf16, #tpu.memory_space<vmem>>, %arg6: memref<64x64xbf16, #tpu.memory_space<vmem>>, %arg7: memref<1152x64xbf16, #tpu.memory_space<vmem>>, %arg8: memref<1x64xf32, #tpu.memory_space<vmem>>, %arg9: memref<1x64xf32, #tpu.memory_space<vmem>>, %arg10: memref<1x64xf32, #tpu.memory_space<vmem>>, %arg11: memref<576x64xbf16, #tpu.memory_space<vmem>>, %arg12: memref<1x64xf32, #tpu.memory_space<vmem>>, %arg13: memref<1x64xf32, #tpu.memory_space<vmem>>, %arg14: memref<1x64xf32, #tpu.memory_space<vmem>>, %arg15: memref<64x64xbf16, #tpu.memory_space<vmem>>, %arg16: memref<64x64xf32, #tpu.memory_space<vmem>>, %arg17: memref<1x16x64xf32, #tpu.memory_space<vmem>>, %arg18: memref<2x16x64xf32, #tpu.memory_space<vmem>>, %arg19: memref<2x2x64xf32, #tpu.memory_space<vmem>>) attributes {dimension_semantics = [#tpu.dimension_semantics<arbitrary>, #tpu.dimension_semantics<arbitrary>], iteration_bounds = array<i64: 3, 2>, scalar_prefetch = 0 : i64, scratch_operands = 2 : i64, tpu.core_type = #tpu.core_type<tc>, window_params = [{transform_indices = @transform_0, window_bounds = array<i64: 1, 16, 192>}, {transform_indices = @transform_1, window_bounds = array<i64: 1, 64, 32>}, {transform_indices = @transform_2, window_bounds = array<i64: 1, 16, 64>}, {pipeline_mode = #tpu.pipeline_mode<synchronous>, transform_indices = @transform_3, window_bounds = array<i64: 16, 16>}, {pipeline_mode = #tpu.pipeline_mode<synchronous>, transform_indices = @transform_4, window_bounds = array<i64: 64, 64>}, {pipeline_mode = #tpu.pipeline_mode<synchronous>, transform_indices = @transform_5, window_bounds = array<i64: 1152, 64>}, {pipeline_mode = #tpu.pipeline_mode<synchronous>, transform_indices = @transform_6, window_bounds = array<i64: 1, 64>}, {pipeline_mode = #tpu.pipeline_mode<synchronous>, transform_indices = @transform_7, window_bounds = array<i64: 1, 64>}, {pipeline_mode = #tpu.pipeline_mode<synchronous>, transform_indices = @transform_8, window_bounds = array<i64: 1, 64>}, {pipeline_mode = #tpu.pipeline_mode<synchronous>, transform_indices = @transform_9, window_bounds = array<i64: 576, 64>}, {pipeline_mode = #tpu.pipeline_mode<synchronous>, transform_indices = @transform_10, window_bounds = array<i64: 1, 64>}, {pipeline_mode = #tpu.pipeline_mode<synchronous>, transform_indices = @transform_11, window_bounds = array<i64: 1, 64>}, {pipeline_mode = #tpu.pipeline_mode<synchronous>, transform_indices = @transform_12, window_bounds = array<i64: 1, 64>}, {pipeline_mode = #tpu.pipeline_mode<synchronous>, transform_indices = @transform_13, window_bounds = array<i64: 64, 64>}, {pipeline_mode = #tpu.pipeline_mode<synchronous>, transform_indices = @transform_14, window_bounds = array<i64: 64, 64>}, {transform_indices = @transform_15, window_bounds = array<i64: 1, 16, 64>}]} {
    %c0_i32 = arith.constant 0 : i32
    %0 = arith.cmpi eq, %arg0, %c0_i32 : i32
    %1 = arith.extui %0 : i1 to i32
    %c0_i32_0 = arith.constant 0 : i32
    %2 = arith.cmpi ne, %1, %c0_i32_0 : i32
    scf.if %2 {
      %c0_i32_3 = arith.constant 0 : i32
      %9 = arith.cmpi eq, %arg1, %c0_i32_3 : i32
      %10 = arith.extui %9 : i1 to i32
      %c0_i32_4 = arith.constant 0 : i32
      %11 = arith.cmpi ne, %10, %c0_i32_4 : i32
      scf.if %11 {
        %cst_46 = arith.constant 0.000000e+00 : f32
        %118 = vector.broadcast %cst_46 : f32 to vector<2x2x64xf32>
        %c0_47 = arith.constant 0 : index
        %c0_48 = arith.constant 0 : index
        %c0_49 = arith.constant 0 : index
        %119 = vector.load %arg19[%c0_47, %c0_48, %c0_49] : memref<2x2x64xf32, #tpu.memory_space<vmem>>, vector<2x2x64xf32>
        tpu.vector_store %arg19[%c0_47, %c0_48, %c0_49], %118 {strides = array<i32>} : memref<2x2x64xf32, #tpu.memory_space<vmem>>, vector<2x2x64xf32>,
      } else {
      }
      %c0 = arith.constant 0 : index
      %c0_5 = arith.constant 0 : index
      %12 = vector.load %arg5[%c0, %c0_5] : memref<16x16xbf16, #tpu.memory_space<vmem>>, vector<16x16xbf16>
      %c0_6 = arith.constant 0 : index
      %c0_7 = arith.constant 0 : index
      %c0_8 = arith.constant 0 : index
      %13 = vector.load %arg2[%c0_6, %c0_7, %c0_8] : memref<1x16x192xbf16, #tpu.memory_space<vmem>>, vector<1x16x192xbf16>
      %14 = vector.shape_cast %13 : vector<1x16x192xbf16> to vector<16x192xbf16>
      %cst = arith.constant dense<0.000000e+00> : vector<16x192xf32>
      %15 = tpu.matmul %12, %14, %cst {dimension_numbers = #tpu.dot_dimension_numbers<[1], [0], [0], [1], [0, 0, 1, 1], [], []>} : vector<16x16xbf16>, vector<16x192xbf16>, vector<16x192xf32> -> vector<16x192xf32>
      %c0_9 = arith.constant 0 : index
      %c0_10 = arith.constant 0 : index
      %16 = vector.load %arg6[%c0_9, %c0_10] : memref<64x64xbf16, #tpu.memory_space<vmem>>, vector<64x64xbf16>
      %c0_11 = arith.constant 0 : index
      %c0_12 = arith.constant 0 : index
      %c0_13 = arith.constant 0 : index
      %17 = vector.load %arg3[%c0_11, %c0_12, %c0_13] : memref<1x64x32xbf16, #tpu.memory_space<vmem>>, vector<1x64x32xbf16>
      %18 = vector.shape_cast %17 : vector<1x64x32xbf16> to vector<64x32xbf16>
      %cst_14 = arith.constant dense<0.000000e+00> : vector<64x32xf32>
      %19 = tpu.matmul %16, %18, %cst_14 {dimension_numbers = #tpu.dot_dimension_numbers<[1], [0], [0], [1], [0, 0, 1, 1], [], []>} : vector<64x64xbf16>, vector<64x32xbf16>, vector<64x32xf32> -> vector<64x32xf32>
      %20 = vector.extract_strided_slice %15 {offsets = [0, 0], sizes = [16, 64], strides = [1, 1]} : vector<16x192xf32> to vector<16x64xf32>
      %21 = vector.extract_strided_slice %15 {offsets = [0, 64], sizes = [16, 64], strides = [1, 1]} : vector<16x192xf32> to vector<16x64xf32>
      %22 = vector.extract_strided_slice %15 {offsets = [0, 128], sizes = [16, 64], strides = [1, 1]} : vector<16x192xf32> to vector<16x64xf32>
      %23 = vector.extract_strided_slice %19 {offsets = [0, 0], sizes = [64, 16], strides = [1, 1]} : vector<64x32xf32> to vector<64x16xf32>
      %24 = vector.extract_strided_slice %19 {offsets = [0, 16], sizes = [64, 16], strides = [1, 1]} : vector<64x32xf32> to vector<64x16xf32>
      %25 = arith.truncf %20 : vector<16x64xf32> to vector<16x64xbf16>
      %26 = arith.truncf %23 : vector<64x16xf32> to vector<64x16xbf16>
      %cst_15 = arith.constant dense<0.000000e+00> : vector<16x16xf32>
      %27 = tpu.matmul %25, %26, %cst_15 {dimension_numbers = #tpu.dot_dimension_numbers<[1], [0], [0], [1], [0, 0, 1, 1], [], []>} : vector<16x64xbf16>, vector<64x16xbf16>, vector<16x16xf32> -> vector<16x16xf32>
      %cst_16 = arith.constant dense<0xFF800000> : vector<16xf32>
      %28 = vector.multi_reduction <maximumf>, %27, %cst_16 [0] : vector<16x16xf32> to vector<16xf32>
      %29 = vector.shape_cast %28 : vector<16xf32> to vector<1x16xf32>
      %30 = vector.broadcast %29 : vector<1x16xf32> to vector<16x16xf32>
      %31 = arith.subf %27, %30 : vector<16x16xf32>
      %32 = math.exp %31 : vector<16x16xf32>
      %cst_17 = arith.constant dense<0.000000e+00> : vector<16xf32>
      %33 = vector.multi_reduction <add>, %32, %cst_17 [0] : vector<16x16xf32> to vector<16xf32>
      %34 = vector.shape_cast %33 : vector<16xf32> to vector<1x16xf32>
      %35 = vector.broadcast %34 : vector<1x16xf32> to vector<16x16xf32>
      %36 = arith.divf %32, %35 : vector<16x16xf32>
      %37 = arith.truncf %36 : vector<16x16xf32> to vector<16x16xbf16>
      %38 = arith.truncf %20 : vector<16x64xf32> to vector<16x64xbf16>
      %cst_18 = arith.constant dense<0.000000e+00> : vector<16x64xf32>
      %39 = tpu.matmul %37, %38, %cst_18 {dimension_numbers = #tpu.dot_dimension_numbers<[1], [0], [0], [1], [0, 0, 1, 1], [], []>} : vector<16x16xbf16>, vector<16x64xbf16>, vector<16x64xf32> -> vector<16x64xf32>
      %40 = arith.truncf %21 : vector<16x64xf32> to vector<16x64xbf16>
      %41 = arith.truncf %24 : vector<64x16xf32> to vector<64x16xbf16>
      %cst_19 = arith.constant dense<0.000000e+00> : vector<16x16xf32>
      %42 = tpu.matmul %40, %41, %cst_19 {dimension_numbers = #tpu.dot_dimension_numbers<[1], [0], [0], [1], [0, 0, 1, 1], [], []>} : vector<16x64xbf16>, vector<64x16xbf16>, vector<16x16xf32> -> vector<16x16xf32>
      %cst_20 = arith.constant dense<0xFF800000> : vector<16xf32>
      %43 = vector.multi_reduction <maximumf>, %42, %cst_20 [0] : vector<16x16xf32> to vector<16xf32>
      %44 = vector.shape_cast %43 : vector<16xf32> to vector<1x16xf32>
      %45 = vector.broadcast %44 : vector<1x16xf32> to vector<16x16xf32>
      %46 = arith.subf %42, %45 : vector<16x16xf32>
      %47 = math.exp %46 : vector<16x16xf32>
      %cst_21 = arith.constant dense<0.000000e+00> : vector<16xf32>
      %48 = vector.multi_reduction <add>, %47, %cst_21 [0] : vector<16x16xf32> to vector<16xf32>
      %49 = vector.shape_cast %48 : vector<16xf32> to vector<1x16xf32>
      %50 = vector.broadcast %49 : vector<1x16xf32> to vector<16x16xf32>
      %51 = arith.divf %47, %50 : vector<16x16xf32>
      %52 = arith.truncf %51 : vector<16x16xf32> to vector<16x16xbf16>
      %53 = arith.truncf %22 : vector<16x64xf32> to vector<16x64xbf16>
      %cst_22 = arith.constant dense<0.000000e+00> : vector<16x64xf32>
      %54 = tpu.matmul %52, %53, %cst_22 {dimension_numbers = #tpu.dot_dimension_numbers<[1], [0], [0], [1], [0, 0, 1, 1], [], []>} : vector<16x16xbf16>, vector<16x64xbf16>, vector<16x64xf32> -> vector<16x64xf32>
      %55 = tpu.concatenate %39, %54 in 1 : vector<16x64xf32>, vector<16x64xf32> -> vector<16x128xf32>
      %56 = arith.truncf %55 : vector<16x128xf32> to vector<16x128xbf16>
      %c0_23 = arith.constant 0 : index
      %c0_24 = arith.constant 0 : index
      %57 = vector.load %arg8[%c0_23, %c0_24] : memref<1x64xf32, #tpu.memory_space<vmem>>, vector<1x64xf32>
      %58 = tpu.iota {dimensions = array<i32: 1>} : vector<1x128xi32>
      %c15_i32 = arith.constant 15 : i32
      %59 = vector.broadcast %c15_i32 : i32 to vector<1x128xi32>
      %60 = arith.andi %58, %59 : vector<1x128xi32>
      %c1_i32_25 = arith.constant 1 : i32
      %61 = vector.broadcast %c1_i32_25 : i32 to vector<1x128xi32>
      %62 = arith.cmpi sge, %60, %61 : vector<1x128xi32>
      %cst_26 = arith.constant 1.000000e+00 : f32
      %cst_27 = arith.constant 0.000000e+00 : f32
      %63 = vector.broadcast %cst_26 : f32 to vector<1x128xf32>
      %64 = vector.broadcast %cst_27 : f32 to vector<1x128xf32>
      %65 = arith.select %62, %63, %64 : vector<1x128xi1>, vector<1x128xf32>
      %66 = arith.truncf %65 : vector<1x128xf32> to vector<1x128xbf16>
      %c14_i32 = arith.constant 14 : i32
      %67 = vector.broadcast %c14_i32 : i32 to vector<1x128xi32>
      %68 = arith.cmpi sle, %60, %67 : vector<1x128xi32>
      %cst_28 = arith.constant 1.000000e+00 : f32
      %cst_29 = arith.constant 0.000000e+00 : f32
      %69 = vector.broadcast %cst_28 : f32 to vector<1x128xf32>
      %70 = vector.broadcast %cst_29 : f32 to vector<1x128xf32>
      %71 = arith.select %68, %69, %70 : vector<1x128xi1>, vector<1x128xf32>
      %72 = arith.truncf %71 : vector<1x128xf32> to vector<1x128xbf16>
      %cst_30 = arith.constant 0.000000e+00 : bf16
      %73 = vector.broadcast %cst_30 : bf16 to vector<16x1xbf16>
      %cst_31 = arith.constant 0.000000e+00 : bf16
      %74 = vector.broadcast %cst_31 : bf16 to vector<1x128xbf16>
      %75 = vector.extract_strided_slice %56 {offsets = [0, 0], sizes = [16, 127], strides = [1, 1]} : vector<16x128xbf16> to vector<16x127xbf16>
      %76 = tpu.concatenate %73, %75 in 1 : vector<16x1xbf16>, vector<16x127xbf16> -> vector<16x128xbf16>
      %77 = vector.broadcast %66 : vector<1x128xbf16> to vector<16x128xbf16>
      %78 = arith.mulf %76, %77 : vector<16x128xbf16>
      %79 = vector.extract_strided_slice %78 {offsets = [0, 0], sizes = [15, 128], strides = [1, 1]} : vector<16x128xbf16> to vector<15x128xbf16>
      %80 = tpu.concatenate %74, %79 in 0 : vector<1x128xbf16>, vector<15x128xbf16> -> vector<16x128xbf16>
      %81 = vector.extract_strided_slice %78 {offsets = [1, 0], sizes = [15, 128], strides = [1, 1]} : vector<16x128xbf16> to vector<15x128xbf16>
      %82 = tpu.concatenate %81, %74 in 0 : vector<15x128xbf16>, vector<1x128xbf16> -> vector<16x128xbf16>
      %83 = vector.extract_strided_slice %56 {offsets = [0, 0], sizes = [15, 128], strides = [1, 1]} : vector<16x128xbf16> to vector<15x128xbf16>
      %84 = tpu.concatenate %74, %83 in 0 : vector<1x128xbf16>, vector<15x128xbf16> -> vector<16x128xbf16>
      %85 = vector.extract_strided_slice %56 {offsets = [1, 0], sizes = [15, 128], strides = [1, 1]} : vector<16x128xbf16> to vector<15x128xbf16>
      %86 = tpu.concatenate %85, %74 in 0 : vector<15x128xbf16>, vector<1x128xbf16> -> vector<16x128xbf16>
      %87 = vector.extract_strided_slice %56 {offsets = [0, 1], sizes = [16, 127], strides = [1, 1]} : vector<16x128xbf16> to vector<16x127xbf16>
      %88 = tpu.concatenate %87, %73 in 1 : vector<16x127xbf16>, vector<16x1xbf16> -> vector<16x128xbf16>
      %89 = vector.broadcast %72 : vector<1x128xbf16> to vector<16x128xbf16>
      %90 = arith.mulf %88, %89 : vector<16x128xbf16>
      %91 = vector.extract_strided_slice %90 {offsets = [0, 0], sizes = [15, 128], strides = [1, 1]} : vector<16x128xbf16> to vector<15x128xbf16>
      %92 = tpu.concatenate %74, %91 in 0 : vector<1x128xbf16>, vector<15x128xbf16> -> vector<16x128xbf16>
      %93 = vector.extract_strided_slice %90 {offsets = [1, 0], sizes = [15, 128], strides = [1, 1]} : vector<16x128xbf16> to vector<15x128xbf16>
      %94 = tpu.concatenate %93, %74 in 0 : vector<15x128xbf16>, vector<1x128xbf16> -> vector<16x128xbf16>
      %95 = tpu.concatenate %80, %78, %82, %84, %56, %86, %92, %90, %94 in 1 : vector<16x128xbf16>, vector<16x128xbf16>, vector<16x128xbf16>, vector<16x128xbf16>, vector<16x128xbf16>, vector<16x128xbf16>, vector<16x128xbf16>, vector<16x128xbf16>, vector<16x128xbf16> -> vector<16x1152xbf16>
      %c0_32 = arith.constant 0 : index
      %c0_33 = arith.constant 0 : index
      %96 = vector.load %arg7[%c0_32, %c0_33] : memref<1152x64xbf16, #tpu.memory_space<vmem>>, vector<1152x64xbf16>
      %cst_34 = arith.constant dense<0.000000e+00> : vector<16x64xf32>
      %97 = tpu.matmul %95, %96, %cst_34 {dimension_numbers = #tpu.dot_dimension_numbers<[1], [0], [0], [1], [0, 0, 1, 1], [], []>} : vector<16x1152xbf16>, vector<1152x64xbf16>, vector<16x64xf32> -> vector<16x64xf32>
      %98 = vector.broadcast %57 : vector<1x64xf32> to vector<16x64xf32>
      %99 = arith.addf %97, %98 : vector<16x64xf32>
      %cst_35 = arith.constant 0.000000e+00 : f32
      %100 = vector.broadcast %cst_35 : f32 to vector<16x64xf32>
      %101 = arith.maximumf %99, %100 : vector<16x64xf32>
      %102 = arith.index_cast %arg1 : i32 to index
      %c0_36 = arith.constant 0 : index
      %c0_37 = arith.constant 0 : index
      %103 = vector.load %arg18[%102, %c0_36, %c0_37] : memref<2x16x64xf32, #tpu.memory_space<vmem>>, vector<1x16x64xf32>
      %104 = vector.shape_cast %103 : vector<1x16x64xf32> to vector<16x64xf32>
      %105 = vector.shape_cast %101 : vector<16x64xf32> to vector<1x16x64xf32>
      tpu.vector_store %arg18[%102, %c0_36, %c0_37], %105 {strides = array<i32>} : memref<2x16x64xf32, #tpu.memory_space<vmem>>, vector<1x16x64xf32>,
      %c0_38 = arith.constant 0 : index
      %c0_39 = arith.constant 0 : index
      %c0_40 = arith.constant 0 : index
      %106 = vector.load %arg19[%c0_38, %c0_39, %c0_40] : memref<2x2x64xf32, #tpu.memory_space<vmem>>, vector<1x2x64xf32>
      %107 = vector.shape_cast %106 : vector<1x2x64xf32> to vector<2x64xf32>
      %cst_41 = arith.constant dense<0.000000e+00> : vector<64xf32>
      %108 = vector.multi_reduction <add>, %101, %cst_41 [0] : vector<16x64xf32> to vector<64xf32>
      %109 = vector.shape_cast %108 : vector<64xf32> to vector<1x64xf32>
      %110 = arith.mulf %101, %101 : vector<16x64xf32>
      %cst_42 = arith.constant dense<0.000000e+00> : vector<64xf32>
      %111 = vector.multi_reduction <add>, %110, %cst_42 [0] : vector<16x64xf32> to vector<64xf32>
      %112 = vector.shape_cast %111 : vector<64xf32> to vector<1x64xf32>
      %113 = tpu.concatenate %109, %112 in 0 : vector<1x64xf32>, vector<1x64xf32> -> vector<2x64xf32>
      %114 = arith.addf %107, %113 : vector<2x64xf32>
      %c0_43 = arith.constant 0 : index
      %c0_44 = arith.constant 0 : index
      %c0_45 = arith.constant 0 : index
      %115 = vector.load %arg19[%c0_43, %c0_44, %c0_45] : memref<2x2x64xf32, #tpu.memory_space<vmem>>, vector<1x2x64xf32>
      %116 = vector.shape_cast %115 : vector<1x2x64xf32> to vector<2x64xf32>
      %117 = vector.shape_cast %114 : vector<2x64xf32> to vector<1x2x64xf32>
      tpu.vector_store %arg19[%c0_43, %c0_44, %c0_45], %117 {strides = array<i32>} : memref<2x2x64xf32, #tpu.memory_space<vmem>>, vector<1x2x64xf32>,
    } else {
    }
    %c1_i32 = arith.constant 1 : i32
    %3 = arith.cmpi eq, %arg0, %c1_i32 : i32
    %4 = arith.extui %3 : i1 to i32
    %c0_i32_1 = arith.constant 0 : i32
    %5 = arith.cmpi ne, %4, %c0_i32_1 : i32
    scf.if %5 {
      %c0_i32_3 = arith.constant 0 : i32
      %9 = arith.cmpi eq, %arg1, %c0_i32_3 : i32
      %10 = arith.extui %9 : i1 to i32
      %c0_i32_4 = arith.constant 0 : i32
      %11 = arith.cmpi ne, %10, %c0_i32_4 : i32
      scf.if %11 {
        %cst_40 = arith.constant 0.000000e+00 : f32
        %101 = vector.broadcast %cst_40 : f32 to vector<2x64xf32>
        %c1_41 = arith.constant 1 : index
        %c0_42 = arith.constant 0 : index
        %c0_43 = arith.constant 0 : index
        %102 = vector.load %arg19[%c1_41, %c0_42, %c0_43] : memref<2x2x64xf32, #tpu.memory_space<vmem>>, vector<1x2x64xf32>
        %103 = vector.shape_cast %102 : vector<1x2x64xf32> to vector<2x64xf32>
        %104 = vector.shape_cast %101 : vector<2x64xf32> to vector<1x2x64xf32>
        tpu.vector_store %arg19[%c1_41, %c0_42, %c0_43], %104 {strides = array<i32>} : memref<2x2x64xf32, #tpu.memory_space<vmem>>, vector<1x2x64xf32>,
      } else {
      }
      %12 = arith.index_cast %arg1 : i32 to index
      %c0 = arith.constant 0 : index
      %c0_5 = arith.constant 0 : index
      %13 = vector.load %arg18[%12, %c0, %c0_5] : memref<2x16x64xf32, #tpu.memory_space<vmem>>, vector<1x16x64xf32>
      %14 = vector.shape_cast %13 : vector<1x16x64xf32> to vector<16x64xf32>
      %c0_6 = arith.constant 0 : index
      %c0_7 = arith.constant 0 : index
      %c0_8 = arith.constant 0 : index
      %15 = vector.load %arg19[%c0_6, %c0_7, %c0_8] : memref<2x2x64xf32, #tpu.memory_space<vmem>>, vector<1x2x64xf32>
      %16 = vector.shape_cast %15 : vector<1x2x64xf32> to vector<2x64xf32>
      %c0_9 = arith.constant 0 : index
      %c0_10 = arith.constant 0 : index
      %17 = vector.load %arg9[%c0_9, %c0_10] : memref<1x64xf32, #tpu.memory_space<vmem>>, vector<1x64xf32>
      %c0_11 = arith.constant 0 : index
      %c0_12 = arith.constant 0 : index
      %18 = vector.load %arg10[%c0_11, %c0_12] : memref<1x64xf32, #tpu.memory_space<vmem>>, vector<1x64xf32>
      %c0_13 = arith.constant 0 : index
      %c0_14 = arith.constant 0 : index
      %19 = vector.load %arg16[%c0_13, %c0_14] : memref<64x64xf32, #tpu.memory_space<vmem>>, vector<64x64xf32>
      %cst = arith.constant dense<0.000000e+00> : vector<2x64xf32>
      %20 = tpu.matmul %16, %19, %cst {dimension_numbers = #tpu.dot_dimension_numbers<[1], [0], [0], [1], [0, 0, 1, 1], [], []>} : vector<2x64xf32>, vector<64x64xf32>, vector<2x64xf32> -> vector<2x64xf32>
      %21 = vector.extract_strided_slice %20 {offsets = [0, 0], sizes = [1, 64], strides = [1, 1]} : vector<2x64xf32> to vector<1x64xf32>
      %cst_15 = arith.constant 0.001953125 : f32
      %22 = vector.broadcast %cst_15 : f32 to vector<1x64xf32>
      %23 = arith.mulf %21, %22 : vector<1x64xf32>
      %24 = vector.extract_strided_slice %20 {offsets = [1, 0], sizes = [1, 64], strides = [1, 1]} : vector<2x64xf32> to vector<1x64xf32>
      %cst_16 = arith.constant 0.001953125 : f32
      %25 = vector.broadcast %cst_16 : f32 to vector<1x64xf32>
      %26 = arith.mulf %24, %25 : vector<1x64xf32>
      %27 = arith.mulf %23, %23 : vector<1x64xf32>
      %28 = arith.subf %26, %27 : vector<1x64xf32>
      %cst_17 = arith.constant 9.99999974E-6 : f32
      %29 = vector.broadcast %cst_17 : f32 to vector<1x64xf32>
      %30 = arith.addf %28, %29 : vector<1x64xf32>
      %31 = math.rsqrt %30 : vector<1x64xf32>
      %32 = arith.mulf %17, %31 : vector<1x64xf32>
      %33 = vector.broadcast %23 : vector<1x64xf32> to vector<16x64xf32>
      %34 = arith.subf %14, %33 : vector<16x64xf32>
      %35 = vector.broadcast %32 : vector<1x64xf32> to vector<16x64xf32>
      %36 = arith.mulf %34, %35 : vector<16x64xf32>
      %37 = vector.broadcast %18 : vector<1x64xf32> to vector<16x64xf32>
      %38 = arith.addf %36, %37 : vector<16x64xf32>
      %39 = arith.truncf %38 : vector<16x64xf32> to vector<16x64xbf16>
      %c0_18 = arith.constant 0 : index
      %c0_19 = arith.constant 0 : index
      %40 = vector.load %arg12[%c0_18, %c0_19] : memref<1x64xf32, #tpu.memory_space<vmem>>, vector<1x64xf32>
      %41 = tpu.iota {dimensions = array<i32: 1>} : vector<1x64xi32>
      %c15_i32 = arith.constant 15 : i32
      %42 = vector.broadcast %c15_i32 : i32 to vector<1x64xi32>
      %43 = arith.andi %41, %42 : vector<1x64xi32>
      %c1_i32_20 = arith.constant 1 : i32
      %44 = vector.broadcast %c1_i32_20 : i32 to vector<1x64xi32>
      %45 = arith.cmpi sge, %43, %44 : vector<1x64xi32>
      %cst_21 = arith.constant 1.000000e+00 : f32
      %cst_22 = arith.constant 0.000000e+00 : f32
      %46 = vector.broadcast %cst_21 : f32 to vector<1x64xf32>
      %47 = vector.broadcast %cst_22 : f32 to vector<1x64xf32>
      %48 = arith.select %45, %46, %47 : vector<1x64xi1>, vector<1x64xf32>
      %49 = arith.truncf %48 : vector<1x64xf32> to vector<1x64xbf16>
      %c14_i32 = arith.constant 14 : i32
      %50 = vector.broadcast %c14_i32 : i32 to vector<1x64xi32>
      %51 = arith.cmpi sle, %43, %50 : vector<1x64xi32>
      %cst_23 = arith.constant 1.000000e+00 : f32
      %cst_24 = arith.constant 0.000000e+00 : f32
      %52 = vector.broadcast %cst_23 : f32 to vector<1x64xf32>
      %53 = vector.broadcast %cst_24 : f32 to vector<1x64xf32>
      %54 = arith.select %51, %52, %53 : vector<1x64xi1>, vector<1x64xf32>
      %55 = arith.truncf %54 : vector<1x64xf32> to vector<1x64xbf16>
      %cst_25 = arith.constant 0.000000e+00 : bf16
      %56 = vector.broadcast %cst_25 : bf16 to vector<16x1xbf16>
      %cst_26 = arith.constant 0.000000e+00 : bf16
      %57 = vector.broadcast %cst_26 : bf16 to vector<1x64xbf16>
      %58 = vector.extract_strided_slice %39 {offsets = [0, 0], sizes = [16, 63], strides = [1, 1]} : vector<16x64xbf16> to vector<16x63xbf16>
      %59 = tpu.concatenate %56, %58 in 1 : vector<16x1xbf16>, vector<16x63xbf16> -> vector<16x64xbf16>
      %60 = vector.broadcast %49 : vector<1x64xbf16> to vector<16x64xbf16>
      %61 = arith.mulf %59, %60 : vector<16x64xbf16>
      %62 = vector.extract_strided_slice %61 {offsets = [0, 0], sizes = [15, 64], strides = [1, 1]} : vector<16x64xbf16> to vector<15x64xbf16>
      %63 = tpu.concatenate %57, %62 in 0 : vector<1x64xbf16>, vector<15x64xbf16> -> vector<16x64xbf16>
      %64 = vector.extract_strided_slice %61 {offsets = [1, 0], sizes = [15, 64], strides = [1, 1]} : vector<16x64xbf16> to vector<15x64xbf16>
      %65 = tpu.concatenate %64, %57 in 0 : vector<15x64xbf16>, vector<1x64xbf16> -> vector<16x64xbf16>
      %66 = vector.extract_strided_slice %39 {offsets = [0, 0], sizes = [15, 64], strides = [1, 1]} : vector<16x64xbf16> to vector<15x64xbf16>
      %67 = tpu.concatenate %57, %66 in 0 : vector<1x64xbf16>, vector<15x64xbf16> -> vector<16x64xbf16>
      %68 = vector.extract_strided_slice %39 {offsets = [1, 0], sizes = [15, 64], strides = [1, 1]} : vector<16x64xbf16> to vector<15x64xbf16>
      %69 = tpu.concatenate %68, %57 in 0 : vector<15x64xbf16>, vector<1x64xbf16> -> vector<16x64xbf16>
      %70 = vector.extract_strided_slice %39 {offsets = [0, 1], sizes = [16, 63], strides = [1, 1]} : vector<16x64xbf16> to vector<16x63xbf16>
      %71 = tpu.concatenate %70, %56 in 1 : vector<16x63xbf16>, vector<16x1xbf16> -> vector<16x64xbf16>
      %72 = vector.broadcast %55 : vector<1x64xbf16> to vector<16x64xbf16>
      %73 = arith.mulf %71, %72 : vector<16x64xbf16>
      %74 = vector.extract_strided_slice %73 {offsets = [0, 0], sizes = [15, 64], strides = [1, 1]} : vector<16x64xbf16> to vector<15x64xbf16>
      %75 = tpu.concatenate %57, %74 in 0 : vector<1x64xbf16>, vector<15x64xbf16> -> vector<16x64xbf16>
      %76 = vector.extract_strided_slice %73 {offsets = [1, 0], sizes = [15, 64], strides = [1, 1]} : vector<16x64xbf16> to vector<15x64xbf16>
      %77 = tpu.concatenate %76, %57 in 0 : vector<15x64xbf16>, vector<1x64xbf16> -> vector<16x64xbf16>
      %78 = tpu.concatenate %63, %61, %65, %67, %39, %69, %75, %73, %77 in 1 : vector<16x64xbf16>, vector<16x64xbf16>, vector<16x64xbf16>, vector<16x64xbf16>, vector<16x64xbf16>, vector<16x64xbf16>, vector<16x64xbf16>, vector<16x64xbf16>, vector<16x64xbf16> -> vector<16x576xbf16>
      %c0_27 = arith.constant 0 : index
      %c0_28 = arith.constant 0 : index
      %79 = vector.load %arg11[%c0_27, %c0_28] : memref<576x64xbf16, #tpu.memory_space<vmem>>, vector<576x64xbf16>
      %cst_29 = arith.constant dense<0.000000e+00> : vector<16x64xf32>
      %80 = tpu.matmul %78, %79, %cst_29 {dimension_numbers = #tpu.dot_dimension_numbers<[1], [0], [0], [1], [0, 0, 1, 1], [], []>} : vector<16x576xbf16>, vector<576x64xbf16>, vector<16x64xf32> -> vector<16x64xf32>
      %81 = vector.broadcast %40 : vector<1x64xf32> to vector<16x64xf32>
      %82 = arith.addf %80, %81 : vector<16x64xf32>
      %cst_30 = arith.constant 0.000000e+00 : f32
      %83 = vector.broadcast %cst_30 : f32 to vector<16x64xf32>
      %84 = arith.maximumf %82, %83 : vector<16x64xf32>
      %85 = arith.index_cast %arg1 : i32 to index
      %c0_31 = arith.constant 0 : index
      %c0_32 = arith.constant 0 : index
      %86 = vector.load %arg18[%85, %c0_31, %c0_32] : memref<2x16x64xf32, #tpu.memory_space<vmem>>, vector<1x16x64xf32>
      %87 = vector.shape_cast %86 : vector<1x16x64xf32> to vector<16x64xf32>
      %88 = vector.shape_cast %84 : vector<16x64xf32> to vector<1x16x64xf32>
      tpu.vector_store %arg18[%85, %c0_31, %c0_32], %88 {strides = array<i32>} : memref<2x16x64xf32, #tpu.memory_space<vmem>>, vector<1x16x64xf32>,
      %c1 = arith.constant 1 : index
      %c0_33 = arith.constant 0 : index
      %c0_34 = arith.constant 0 : index
      %89 = vector.load %arg19[%c1, %c0_33, %c0_34] : memref<2x2x64xf32, #tpu.memory_space<vmem>>, vector<1x2x64xf32>
      %90 = vector.shape_cast %89 : vector<1x2x64xf32> to vector<2x64xf32>
      %cst_35 = arith.constant dense<0.000000e+00> : vector<64xf32>
      %91 = vector.multi_reduction <add>, %84, %cst_35 [0] : vector<16x64xf32> to vector<64xf32>
      %92 = vector.shape_cast %91 : vector<64xf32> to vector<1x64xf32>
      %93 = arith.mulf %84, %84 : vector<16x64xf32>
      %cst_36 = arith.constant dense<0.000000e+00> : vector<64xf32>
      %94 = vector.multi_reduction <add>, %93, %cst_36 [0] : vector<16x64xf32> to vector<64xf32>
      %95 = vector.shape_cast %94 : vector<64xf32> to vector<1x64xf32>
      %96 = tpu.concatenate %92, %95 in 0 : vector<1x64xf32>, vector<1x64xf32> -> vector<2x64xf32>
      %97 = arith.addf %90, %96 : vector<2x64xf32>
      %c1_37 = arith.constant 1 : index
      %c0_38 = arith.constant 0 : index
      %c0_39 = arith.constant 0 : index
      %98 = vector.load %arg19[%c1_37, %c0_38, %c0_39] : memref<2x2x64xf32, #tpu.memory_space<vmem>>, vector<1x2x64xf32>
      %99 = vector.shape_cast %98 : vector<1x2x64xf32> to vector<2x64xf32>
      %100 = vector.shape_cast %97 : vector<2x64xf32> to vector<1x2x64xf32>
      tpu.vector_store %arg19[%c1_37, %c0_38, %c0_39], %100 {strides = array<i32>} : memref<2x2x64xf32, #tpu.memory_space<vmem>>, vector<1x2x64xf32>,
    } else {
    }
    %c2_i32 = arith.constant 2 : i32
    %6 = arith.cmpi eq, %arg0, %c2_i32 : i32
    %7 = arith.extui %6 : i1 to i32
    %c0_i32_2 = arith.constant 0 : i32
    %8 = arith.cmpi ne, %7, %c0_i32_2 : i32
    scf.if %8 {
      %9 = arith.index_cast %arg1 : i32 to index
      %c0 = arith.constant 0 : index
      %c0_3 = arith.constant 0 : index
      %10 = vector.load %arg18[%9, %c0, %c0_3] : memref<2x16x64xf32, #tpu.memory_space<vmem>>, vector<1x16x64xf32>
      %11 = vector.shape_cast %10 : vector<1x16x64xf32> to vector<16x64xf32>
      %c1 = arith.constant 1 : index
      %c0_4 = arith.constant 0 : index
      %c0_5 = arith.constant 0 : index
      %12 = vector.load %arg19[%c1, %c0_4, %c0_5] : memref<2x2x64xf32, #tpu.memory_space<vmem>>, vector<1x2x64xf32>
      %13 = vector.shape_cast %12 : vector<1x2x64xf32> to vector<2x64xf32>
      %c0_6 = arith.constant 0 : index
      %c0_7 = arith.constant 0 : index
      %14 = vector.load %arg13[%c0_6, %c0_7] : memref<1x64xf32, #tpu.memory_space<vmem>>, vector<1x64xf32>
      %c0_8 = arith.constant 0 : index
      %c0_9 = arith.constant 0 : index
      %15 = vector.load %arg14[%c0_8, %c0_9] : memref<1x64xf32, #tpu.memory_space<vmem>>, vector<1x64xf32>
      %c0_10 = arith.constant 0 : index
      %c0_11 = arith.constant 0 : index
      %16 = vector.load %arg16[%c0_10, %c0_11] : memref<64x64xf32, #tpu.memory_space<vmem>>, vector<64x64xf32>
      %cst = arith.constant dense<0.000000e+00> : vector<2x64xf32>
      %17 = tpu.matmul %13, %16, %cst {dimension_numbers = #tpu.dot_dimension_numbers<[1], [0], [0], [1], [0, 0, 1, 1], [], []>} : vector<2x64xf32>, vector<64x64xf32>, vector<2x64xf32> -> vector<2x64xf32>
      %18 = vector.extract_strided_slice %17 {offsets = [0, 0], sizes = [1, 64], strides = [1, 1]} : vector<2x64xf32> to vector<1x64xf32>
      %cst_12 = arith.constant 0.001953125 : f32
      %19 = vector.broadcast %cst_12 : f32 to vector<1x64xf32>
      %20 = arith.mulf %18, %19 : vector<1x64xf32>
      %21 = vector.extract_strided_slice %17 {offsets = [1, 0], sizes = [1, 64], strides = [1, 1]} : vector<2x64xf32> to vector<1x64xf32>
      %cst_13 = arith.constant 0.001953125 : f32
      %22 = vector.broadcast %cst_13 : f32 to vector<1x64xf32>
      %23 = arith.mulf %21, %22 : vector<1x64xf32>
      %24 = arith.mulf %20, %20 : vector<1x64xf32>
      %25 = arith.subf %23, %24 : vector<1x64xf32>
      %cst_14 = arith.constant 9.99999974E-6 : f32
      %26 = vector.broadcast %cst_14 : f32 to vector<1x64xf32>
      %27 = arith.addf %25, %26 : vector<1x64xf32>
      %28 = math.rsqrt %27 : vector<1x64xf32>
      %29 = arith.mulf %14, %28 : vector<1x64xf32>
      %30 = vector.broadcast %20 : vector<1x64xf32> to vector<16x64xf32>
      %31 = arith.subf %11, %30 : vector<16x64xf32>
      %32 = vector.broadcast %29 : vector<1x64xf32> to vector<16x64xf32>
      %33 = arith.mulf %31, %32 : vector<16x64xf32>
      %34 = vector.broadcast %15 : vector<1x64xf32> to vector<16x64xf32>
      %35 = arith.addf %33, %34 : vector<16x64xf32>
      %cst_15 = arith.constant 5.000000e-01 : f32
      %36 = vector.broadcast %cst_15 : f32 to vector<16x64xf32>
      %37 = arith.mulf %36, %35 : vector<16x64xf32>
      %38 = math.tanh %37 : vector<16x64xf32>
      %cst_16 = arith.constant 1.000000e+00 : f32
      %39 = vector.broadcast %cst_16 : f32 to vector<16x64xf32>
      %40 = arith.addf %38, %39 : vector<16x64xf32>
      %cst_17 = arith.constant 5.000000e-01 : f32
      %41 = vector.broadcast %cst_17 : f32 to vector<16x64xf32>
      %42 = arith.mulf %41, %40 : vector<16x64xf32>
      %43 = arith.truncf %42 : vector<16x64xf32> to vector<16x64xbf16>
      %c0_18 = arith.constant 0 : index
      %c0_19 = arith.constant 0 : index
      %44 = vector.load %arg15[%c0_18, %c0_19] : memref<64x64xbf16, #tpu.memory_space<vmem>>, vector<64x64xbf16>
      %cst_20 = arith.constant dense<0.000000e+00> : vector<16x64xf32>
      %45 = tpu.matmul %43, %44, %cst_20 {dimension_numbers = #tpu.dot_dimension_numbers<[1], [0], [0], [1], [0, 0, 1, 1], [], []>} : vector<16x64xbf16>, vector<64x64xbf16>, vector<16x64xf32> -> vector<16x64xf32>
      %c0_21 = arith.constant 0 : index
      %c0_22 = arith.constant 0 : index
      %c0_23 = arith.constant 0 : index
      %46 = vector.load %arg4[%c0_21, %c0_22, %c0_23] : memref<1x16x64xf32, #tpu.memory_space<vmem>>, vector<1x16x64xf32>
      %47 = vector.shape_cast %46 : vector<1x16x64xf32> to vector<16x64xf32>
      %48 = arith.mulf %47, %45 : vector<16x64xf32>
      %c0_24 = arith.constant 0 : index
      %c0_25 = arith.constant 0 : index
      %c0_26 = arith.constant 0 : index
      %49 = vector.load %arg17[%c0_24, %c0_25, %c0_26] : memref<1x16x64xf32, #tpu.memory_space<vmem>>, vector<1x16x64xf32>
      %50 = vector.shape_cast %49 : vector<1x16x64xf32> to vector<16x64xf32>
      %51 = vector.shape_cast %48 : vector<16x64xf32> to vector<1x16x64xf32>
      tpu.vector_store %arg17[%c0_24, %c0_25, %c0_26], %51 {strides = array<i32>} : memref<1x16x64xf32, #tpu.memory_space<vmem>>, vector<1x16x64xf32>,
    } else {
    }
    return
  }
  func.func @transform_0(%arg0: i32, %arg1: i32) -> (i32, i32, i32) {
    %c0_i32 = arith.constant 0 : i32
    %c0_i32_0 = arith.constant 0 : i32
    %c0_i32_1 = arith.constant 0 : i32
    return %arg1, %c0_i32, %c0_i32_0 : i32, i32, i32
  }
  func.func @transform_1(%arg0: i32, %arg1: i32) -> (i32, i32, i32) {
    %c0_i32 = arith.constant 0 : i32
    %c0_i32_0 = arith.constant 0 : i32
    %c0_i32_1 = arith.constant 0 : i32
    return %arg1, %c0_i32, %c0_i32_0 : i32, i32, i32
  }
  func.func @transform_2(%arg0: i32, %arg1: i32) -> (i32, i32, i32) {
    %c0_i32 = arith.constant 0 : i32
    %c0_i32_0 = arith.constant 0 : i32
    %c0_i32_1 = arith.constant 0 : i32
    return %arg1, %c0_i32, %c0_i32_0 : i32, i32, i32
  }
  func.func @transform_3(%arg0: i32, %arg1: i32) -> (i32, i32) {
    %c0_i32 = arith.constant 0 : i32
    %c0_i32_0 = arith.constant 0 : i32
    %c0_i32_1 = arith.constant 0 : i32
    return %c0_i32, %c0_i32_0 : i32, i32
  }
  func.func @transform_4(%arg0: i32, %arg1: i32) -> (i32, i32) {
    %c0_i32 = arith.constant 0 : i32
    %c0_i32_0 = arith.constant 0 : i32
    %c0_i32_1 = arith.constant 0 : i32
    return %c0_i32, %c0_i32_0 : i32, i32
  }
  func.func @transform_5(%arg0: i32, %arg1: i32) -> (i32, i32) {
    %c0_i32 = arith.constant 0 : i32
    %c0_i32_0 = arith.constant 0 : i32
    %c0_i32_1 = arith.constant 0 : i32
    return %c0_i32, %c0_i32_0 : i32, i32
  }
  func.func @transform_6(%arg0: i32, %arg1: i32) -> (i32, i32) {
    %c0_i32 = arith.constant 0 : i32
    %c0_i32_0 = arith.constant 0 : i32
    %c0_i32_1 = arith.constant 0 : i32
    return %c0_i32, %c0_i32_0 : i32, i32
  }
  func.func @transform_7(%arg0: i32, %arg1: i32) -> (i32, i32) {
    %c0_i32 = arith.constant 0 : i32
    %c0_i32_0 = arith.constant 0 : i32
    %c0_i32_1 = arith.constant 0 : i32
    return %c0_i32, %c0_i32_0 : i32, i32
  }
  func.func @transform_8(%arg0: i32, %arg1: i32) -> (i32, i32) {
    %c0_i32 = arith.constant 0 : i32
    %c0_i32_0 = arith.constant 0 : i32
    %c0_i32_1 = arith.constant 0 : i32
    return %c0_i32, %c0_i32_0 : i32, i32
  }
  func.func @transform_9(%arg0: i32, %arg1: i32) -> (i32, i32) {
    %c0_i32 = arith.constant 0 : i32
    %c0_i32_0 = arith.constant 0 : i32
    %c0_i32_1 = arith.constant 0 : i32
    return %c0_i32, %c0_i32_0 : i32, i32
  }
  func.func @transform_10(%arg0: i32, %arg1: i32) -> (i32, i32) {
    %c0_i32 = arith.constant 0 : i32
    %c0_i32_0 = arith.constant 0 : i32
    %c0_i32_1 = arith.constant 0 : i32
    return %c0_i32, %c0_i32_0 : i32, i32
  }
  func.func @transform_11(%arg0: i32, %arg1: i32) -> (i32, i32) {
    %c0_i32 = arith.constant 0 : i32
    %c0_i32_0 = arith.constant 0 : i32
    %c0_i32_1 = arith.constant 0 : i32
    return %c0_i32, %c0_i32_0 : i32, i32
  }
  func.func @transform_12(%arg0: i32, %arg1: i32) -> (i32, i32) {
    %c0_i32 = arith.constant 0 : i32
    %c0_i32_0 = arith.constant 0 : i32
    %c0_i32_1 = arith.constant 0 : i32
    return %c0_i32, %c0_i32_0 : i32, i32
  }
  func.func @transform_13(%arg0: i32, %arg1: i32) -> (i32, i32) {
    %c0_i32 = arith.constant 0 : i32
    %c0_i32_0 = arith.constant 0 : i32
    %c0_i32_1 = arith.constant 0 : i32
    return %c0_i32, %c0_i32_0 : i32, i32
  }
  func.func @transform_14(%arg0: i32, %arg1: i32) -> (i32, i32) {
    %c0_i32 = arith.constant 0 : i32
    %c0_i32_0 = arith.constant 0 : i32
    %c0_i32_1 = arith.constant 0 : i32
    return %c0_i32, %c0_i32_0 : i32, i32
  }
  func.func @transform_15(%arg0: i32, %arg1: i32) -> (i32, i32, i32) {
    %c0_i32 = arith.constant 0 : i32
    %c0_i32_0 = arith.constant 0 : i32
    %c0_i32_1 = arith.constant 0 : i32
    return %arg1, %c0_i32, %c0_i32_0 : i32, i32, i32
  }
}

</mosaic_0001>

<bundles_post_ra>
// kernel: axis_attention_forward.1
= control target key start
LH: loop header
LB: loop body
LE: loop exit
PB: predicated region body
PF: predicated region fallthrough
CT: control target
= control target key end

     0   :  { %s3448_s18 = smov 0   ;;  %s3450_s19 = smov 0   ;;  %s4066_s0 = inlined_call_operand.vmem [shape: bf16[2,16,192], index: 0, kind: input, shape index: {}]   ;;  %s4067_s1 = inlined_call_operand.vmem [shape: bf16[2,64,32], index: 1, kind: input, shape index: {}]   ;;  %s4068_s2 = inlined_call_operand.vmem [shape: f32[2,16,64], index: 2, kind: input, shape index: {}]   ;;  %s4069_s3 = inlined_call_operand.vmem [shape: bf16[16,16], index: 3, kind: input, shape index: {}]   ;;  %s4070_s4 = inlined_call_operand.vmem [shape: bf16[64,64], index: 4, kind: input, shape index: {}]   ;;  %s4071_s5 = inlined_call_operand.vmem [shape: bf16[1152,64], index: 5, kind: input, shape index: {}]   ;;  %s4072_s6 = inlined_call_operand.vmem [shape: f32[1,64], index: 6, kind: input, shape index: {}]   ;;  %s4073_s7 = inlined_call_operand.vmem [shape: f32[1,64], index: 7, kind: input, shape index: {}]   ;;  %s4074_s8 = inlined_call_operand.vmem [shape: f32[1,64], index: 8, kind: input, shape index: {}]   ;;  %s4075_s9 = inlined_call_operand.vmem [shape: bf16[576,64], index: 9, kind: input, shape index: {}]   ;;  %s4076_s10 = inlined_call_operand.vmem [shape: f32[1,64], index: 10, kind: input, shape index: {}]   ;;  %s4077_s11 = inlined_call_operand.vmem [shape: f32[1,64], index: 11, kind: input, shape index: {}]   ;;  %s4078_s12 = inlined_call_operand.vmem [shape: f32[1,64], index: 12, kind: input, shape index: {}]   ;;  %s4079_s13 = inlined_call_operand.vmem [shape: bf16[64,64], index: 13, kind: input, shape index: {}]   ;;  %s4080_s14 = inlined_call_operand.vmem [shape: f32[64,64], index: 14, kind: input, shape index: {}]   ;;  %s4081_s15 = inlined_call_operand.vmem [shape: f32[2,16,64], index: 15, kind: output, shape index: {}]  }
   0x1   :  { %4085 = sst [smem:[#allocation9_spill]] %s4077_s11  ;;  %s3452_s20 = smov 0  }
   0x2   :  { %4086 = sst [smem:[#allocation10_spill]] %s4078_s12  ;;  %s3454_s21 = smov 0  }
   0x3   :  { %s3456_s22 = smov 0  }
   0x4 LB: > { %4087 = sst [smem:[#allocation4_spill]] %s3347_s20  ;;  %s34_s23 = sadd.s32 1, %s3347_s20  ;;  %s3355_s22 = sphi %s3456_s22, %s25_s22   ;;  %s3351_s21 = sphi %s3454_s21, %s4106_s21   ;;  %s3347_s20 = sphi %s3452_s20, %s4105_s20   ;;  %s3343_s19 = sphi %s3450_s19, %s4104_s19   ;;  %s3339_s18 = sphi %s3448_s18, %s4103_s18  }
   0x5   : > { %4088 = sst [smem:[#allocation5_spill]] %s3351_s21  ;;  %s37_s24 = sadd.s32 1, %s3351_s21 }
   0x6   : > { %4089 = sst [smem:[#allocation6_spill]] %s3355_s22  ;;  %p35_p0 = scmp.ge.s32.totalorder %s34_s23, 2 }
   0x7   : > { %p2585_p1 = scmp.ge.s32.totalorder %s3355_s22, 1  ;;  %p469_p2 = scmp.lt.s32.totalorder %s3355_s22, 7 }
   0x8   : > { %s4108_s23 = smov (%p35_p0, %s34_s23), 0  ;;  %s4110_s24 = smov (!%p35_p0, %s37_s24), %s3351_s21 }
   0x9   : > { %4090 = sst [smem:[#allocation7_spill]] %s4108_s23  ;;  %p470_p3 = pnand %p2585_p1, %p469_p2 }
   0xa   : > { %p39_p4 = scmp.ge.s32.totalorder %s4110_s24, 3  ;;  %p527_p5 = scmp.lt.s32.totalorder (!%p470_p3), %s3339_s18, 1 }
   0xb   : > { %473 = sbr.rel (%p470_p3) target bundleno = 2106 (0x83a), region = 80  ;;  %p2594_p6 = scmp.ne.s32.totalorder (!%p470_p3), %s3343_s19, 0 }
   0xc   : > { %s4112_s24 = smov (%p39_p4, %s4110_s24), 0 }
   0xd   : > { %4091 = sst [smem:[#allocation8_spill]] %s4112_s24 }
  0x10   : > { %s528_s25 = scalar_select %p527_p5, %s3339_s18, 1 }
  0x11   : > { %551 = sbr.rel (%p2594_p6) target bundleno = 1133 (0x46d), region = 84  ;;  %p2595_p7 = scmp.ne.s32.totalorder (!%p2594_p6), %s3339_s18, 0 }
  0x12   : > { %s3110_s26 = sshll.u32 %s528_s25, 4  ;;  %s3111_s27 = sshll.u32 %s528_s25, 5 }
  0x13   : > { %s3487_s30 = scalar_lea.vmem %s4066_s0, %s3110_s26  ;;  %s536_s23 = scalar_lea.vmem %s4067_s1, %s3111_s27 }
  0x14   : > { %s3495_s24 = scalar_lea.vmem %s4068_s2, %s3110_s26  ;;  %s3500_s11 = scalar_lea.vmem %s4081_s15, %s3110_s26 }
  0x16   : > { %555 = sbr.rel (%p2595_p7) target bundleno = 30 (0x1e), region = 88 }
  0x1b   : > { %vm556_vm0 = vcmask 517120   ;;  %v3357_v0 = vmov 0.0  }
  0x1c   : > { %557 = vst.msk [vmem:[#allocation3] sm:$0x3] %vm556_vm0, %v3357_v0 }
  0x1d   : > { %558 = vst.msk [vmem:[#allocation3 + $0x2] sm:$0x3] %vm556_vm0, %v3357_v0 }
  0x1e PF: > { %v3124_v1 = vld [vmem:[%s536_s23 + $0x18] sm:$0xff]  ;;  %v3123_v2 = vld [vmem:[%s536_s23 + $0x10] sm:$0xff]  ;;  %v3122_v3 = vld [vmem:[%s536_s23 + $0x8] sm:$0xff]  ;;  %vm670_vm1 = vcmask 523264   ;;  %vm578_vm2 = vcmask 130048   ;;  %s3358_s16 = smov 112  }
  0x1f   : > { %687 = vmatpush.bf16.msra.mxu2 %v3124_v1  ;;  %v3121_v4 = vld [vmem:[%s536_s23] sm:$0xff]  ;;  %v3118_v6 = vld [vmem:[%s4070_s4 + $0x8] sm:$0xff]  ;;  %v3119_v11 = vld [vmem:[%s4070_s4 + $0x10] sm:$0xff]  ;;  %s3359_s17 = smov 64   ;;  %s3361_s22 = smov 1   ;;  %vm941_vm11 = vcmask 1040384  }
  0x20   : > { %v3117_v5 = vld [vmem:[%s4070_s4] sm:$0xff]  ;;  %v3116_v8 = vld [vmem:[%s3487_s30 + $0x4] sm:$0xf0]  ;;  %v3120_v12 = vld [vmem:[%s4070_s4 + $0x18] sm:$0xff]  ;;  %vm942_vm12 = vsmask.f32 256 }
  0x21   : > { %v2602_v7 = vld [vmem:[%s3487_s30] sm:$0xf]  ;;  %v3115_v28 = vld [vmem:[%s3487_s30 + $0x4] sm:$0xf]  ;;  %v2604_v29 = vld [vmem:[%s3487_s30 + $0x8] sm:$0xf0] }
  0x22   : > { %v2603_v9 = vor.u32 %v3116_v8, %v2602_v7  ;;  %v3114_v10 = vld [vmem:[%s4069_s3] sm:$0xff]  ;;  %v2607_v30 = vor.u32 %v3115_v28, %v2604_v29  ;;  %vm3666_vm13 = vmand %vm941_vm11, %vm942_vm12  ;;  %vm967_vm15 = vcmask 1039360   ;;  %s2938_s25 = sshll.u32 %s3339_s18, 4 }
  0x23   : > { %688 = vmatpush.bf16.msra.mxu2 %v3123_v2  ;;  %s1707_s26 = scalar_lea.vmem [#allocation2], %s2938_s25 }
  0x24   : > { %589 = vmatpush.bf16.msra.mxu1 %v2603_v9 }
  0x27   : > { %689 = vmatpush.bf16.msra.mxu2 %v3122_v3  ;;  %2608 = vmatmul.msk.bf16.vlgmr.msra.gmra.mxu1 %vm578_vm2, %v3114_v10 }
  0x28   : > { %603 = vmatpush.bf16.msrb.mxu1 %v2607_v30 }
  0x2b   : > { %690 = vmatpush.bf16.msra.mxu2 %v3121_v4 }
  0x2e   : > { %2642 = vmatmul.msk.bf16.vlgmr.msra.gmra.mxu2 %vm670_vm1, %v3117_v5 }
  0x37   : > { %2609 = vmatmul.msk.bf16.vlgmr.msrb.gmra.mxu1 %vm578_vm2, %v3114_v10 }
  0x3e   : > { %2643 = vmatmul.msk.bf16.gmra.mxu2 %vm670_vm1, %v3118_v6 }
  0x4e   : > { %2644 = vmatmul.msk.bf16.gmra.mxu2 %vm670_vm1, %v3119_v11 }
  0x5e   : > { %2645 = vmatmul.msk.bf16.gmra.mxu2 %vm670_vm1, %v3120_v12 }
  0xa4   : > { %v591_v18 = vpop.f32.mrf.mxu1 }
  0xac   : > { %v593_v21 = vpop.f32.mrf.mxu1 }
  0xad   : > { %v712_v22 = vpack.c.bf16 %v593_v21, %v591_v18 }
  0xaf   : > { %793 = vrot.lane.b32.xlu2 %v712_v22, %s3359_s17  ;;  %785 = vmatpush.bf16.msra.mxu0 %v712_v22 }
  0xb1   : > { %v692_v13 = vpop.f32.mrf.mxu2 }
  0xb4   : > { %v605_v59 = vpop.f32.mrf.mxu1 }
  0xb9   : > { %v694_v14 = vpop.f32.mrf.mxu2 }
  0xba   : > { %v713_v20 = vpack.c.bf16 %v694_v14, %v692_v13 }
  0xbc   : > { %v607_v63 = vpop.f32.mrf.mxu1 }
  0xbd   : > { %v869_v0 = vpack.c.bf16 %v607_v63, %v605_v59  ;;  %v3149_v63 = vld [vmem:[%s4071_s5 + $0xc0] sm:$0xff] }
  0xc1   : > { %v697_v15 = vpop.f32.mrf.mxu2 }
  0xc9   : > { %v699_v16 = vpop.f32.mrf.mxu2 }
  0xca   : > { %v714_v17 = vpack.c.bf16 %v699_v16, %v697_v15 }
  0xcc   : > { %801 = vrot.lane.b32.xlu1 %v714_v17, %s3358_s16 }
  0xd1   : > { %v702_v19 = vpop.f32.mrf.mxu2 }
  0xd4   : > { %799 = vrot.lane.b32.xlu1 %v713_v20, %s3358_s16 }
  0xd9   : > { %v704_v23 = vpop.f32.mrf.mxu2 }
  0xda   : > { %v715_v27 = vpack.c.bf16 %v704_v23, %v702_v19 }
  0xe1   : > { %v707_v24 = vpop.f32.mrf.mxu2 }
  0xe9   : > { %v709_v25 = vpop.f32.mrf.mxu2 }
  0xea   : > { %v716_v26 = vpack.c.bf16 %v709_v25, %v707_v24 }
  0xec   : > { %805 = vrot.lane.b32.xlu0 %v716_v26, %s3358_s16  ;;  %724 = vmatpush.bf16.msra.mxu3 %v716_v26 }
  0xf0   : > { %725 = vmatpush.bf16.msra.mxu3 %v715_v27 }
  0xf4   : > { %803 = vrot.lane.b32.xlu0 %v715_v27, %s3358_s16  ;;  %726 = vmatpush.bf16.msra.mxu3 %v714_v17 }
  0xf8   : > { %727 = vmatpush.bf16.msra.mxu3 %v713_v20 }
  0xfb   : > { %2646 = vmatmul.msk.bf16.vlgmr.msra.gmra.mxu3 %vm670_vm1, %v712_v22 }
  0xfc   : > { %880 = vmatpush.bf16.msrb.mxu3 %v869_v0  ;;  %v3132_v0 = vld [vmem:[%s4071_s5 + $0x38] sm:$0xff] }
  0xfd   : > { %1578 = vmatpush.bf16.msrb.mxu0 %v3132_v0  ;;  %v3178_v0 = vld [vmem:[%s4071_s5 + $0x1a8] sm:$0xff] }
 0x109   : > { %v794_v35 = vpop.permute.xlu2 %793 }
 0x13e   : > { %v802_v32 = vpop.permute.xlu1 %801 }
 0x146   : > { %v800_v34 = vpop.permute.xlu1 %799 }
 0x15e   : > { %v806_v31 = vpop.permute.xlu0 %805 }
 0x15f   : > { %818 = vmatpush.bf16.msra.mxu1 %v806_v31 }
 0x166   : > { %v804_v33 = vpop.permute.xlu0 %803 }
 0x167   : > { %819 = vmatpush.bf16.msra.mxu1 %v804_v33 }
 0x16b   : > { %820 = vmatpush.bf16.msra.mxu1 %v802_v32 }
 0x16f   : > { %821 = vmatpush.bf16.msra.mxu1 %v800_v34 }
 0x172   : > { %2648 = vmatmul.msk.bf16.vlgmr.msra.gmra.mxu1 %vm670_vm1, %v794_v35 }
 0x17e   : > { %v729_v36 = vpop.f32.mrf.mxu3 }
 0x17f   : > { %v734_v37 = vsel %vm578_vm2, %v729_v36, -inf }
 0x186   : > { %v731_v38 = vpop.f32.mrf.mxu3 }
 0x187   : > { %v735_v39 = vsel %vm578_vm2, %v731_v38, -inf }
 0x188   : > { %v736_v40 = vmax.f32 %v734_v37, %v735_v39 }
 0x18a   : > { %v737_v41 = vrot.slane %v736_v40, 4 }
 0x18c   : > { %v738_v42 = vmax.f32 %v736_v40, %v737_v41 }
 0x18e   : > { %v739_v43 = vrot.slane %v738_v42, 2 }
 0x190   : > { %v740_v44 = vmax.f32 %v738_v42, %v739_v43 }
 0x192   : > { %v741_v45 = vrot.slane %v740_v44, 1 }
 0x194   : > { %v742_v46 = vmax.f32 %v740_v44, %v741_v45 }
 0x196   : > { %v743_v47 = vsub.f32 %v729_v36, %v742_v46  ;;  %v744_v48 = vsub.f32 %v731_v38, %v742_v46 }
 0x198   : > { %v745_v49 = vmul.f32 1.442695, %v743_v47  ;;  %v747_v50 = vmul.f32 1.442695, %v744_v48 }
 0x19a   : > { %3294 = vpow2.f32 %v745_v49 }
 0x19b   : > { %3296 = vpow2.f32 %v747_v50 }
 0x1a0   : > { %v3295_v51 = vpop.eup %3294 }
 0x1a1   : > { %v3297_v52 = vpop.eup %3296  ;;  %v749_v53 = vsel %vm578_vm2, %v3295_v51, 0.0 }
 0x1a2   : > { %v750_v54 = vsel %vm578_vm2, %v3297_v52, 0.0 }
 0x1a3   : > { %v751_v55 = vadd.f32 %v750_v54, %v749_v53  ;;  %v3156_v53 = vld [vmem:[%s4071_s5 + $0xf8] sm:$0xff]  ;;  %v3155_v54 = vld [vmem:[%s4071_s5 + $0xf0] sm:$0xff] }
 0x1a4   : > { %1620 = vmatpush.bf16.msrb.mxu2 %v3156_v53  ;;  %v3183_v53 = vld [vmem:[%s4071_s5 + $0x1d0] sm:$0xff] }
 0x1a5   : > { %v752_v56 = vrot.slane %v751_v55, 4 }
 0x1a7   : > { %v753_v57 = vadd.f32 %v752_v56, %v751_v55  ;;  %v3154_v55 = vld [vmem:[%s4071_s5 + $0xe8] sm:$0xff]  ;;  %v3153_v56 = vld [vmem:[%s4071_s5 + $0xe0] sm:$0xff] }
 0x1a8   : > { %1621 = vmatpush.bf16.msrb.mxu2 %v3155_v54  ;;  %v3141_v54 = vld [vmem:[%s4071_s5 + $0x80] sm:$0xff] }
 0x1a9   : > { %v754_v58 = vrot.slane %v753_v57, 2 }
 0x1ab   : > { %v755_v60 = vadd.f32 %v754_v58, %v753_v57 }
 0x1ac   : > { %1622 = vmatpush.bf16.msrb.mxu2 %v3154_v55  ;;  %v3161_v55 = vld [vmem:[%s4071_s5 + $0x120] sm:$0xff] }
 0x1ad   : > { %v756_v61 = vrot.slane %v755_v60, 1 }
 0x1af   : > { %v757_v62 = vadd.f32 %v756_v61, %v755_v60  ;;  %v3152_v60 = vld [vmem:[%s4071_s5 + $0xd8] sm:$0xff]  ;;  %v3151_v61 = vld [vmem:[%s4071_s5 + $0xd0] sm:$0xff] }
 0x1b0   : > { %1623 = vmatpush.bf16.msrb.mxu2 %v3153_v56  ;;  %v3180_v56 = vld [vmem:[%s4071_s5 + $0x1b8] sm:$0xff] }
 0x1b1   : > { %3298 = vrcp.f32 %v757_v62  ;;  %v769_v4 = vand.u32 2147483648, %v757_v62  ;;  %v767_v6 = vand.u32 2147483647, %v757_v62  ;;  %vm763_vm4 = vweird.f32 %v757_v62 }
 0x1b3   : > { %v770_v8 = vor.u32 1.1754944e-38, %v769_v4  ;;  %vm768_vm6 = vcmp.eq.f32.partialorder %v767_v6, 8.507059e+37  ;;  %v3148_v4 = vld [vmem:[%s4071_s5 + $0xb8] sm:$0xff]  ;;  %v3147_v6 = vld [vmem:[%s4071_s5 + $0xb0] sm:$0xff] }
 0x1b4   : > { %1624 = vmatpush.bf16.msrb.mxu2 %v3152_v60  ;;  %1606 = vmatpush.bf16.msra.mxu3 %v3148_v4  ;;  %v3179_v60 = vld [vmem:[%s4071_s5 + $0x1b0] sm:$0xff] }
 0x1b5   : > { %v3167_v4 = vld [vmem:[%s4071_s5 + $0x150] sm:$0xff] }
 0x1b7   : > { %v3299_v1 = vpop.eup %3298 }
 0x1b8   : > { %v759_v2 = vmul.f32 %v3299_v1, %v757_v62  ;;  %vm764_vm3 = vweird.f32 %v3299_v1  ;;  %1625 = vmatpush.bf16.msrb.mxu2 %v3151_v61  ;;  %v3150_v62 = vld [vmem:[%s4071_s5 + $0xc8] sm:$0xff]  ;;  %1607 = vmatpush.bf16.msra.mxu3 %v3147_v6  ;;  %v3169_v61 = vld [vmem:[%s4071_s5 + $0x160] sm:$0xff]  ;;  %v900_v6 = vlaneseq }
 0x1b9   : > { %vm765_vm5 = vmor %vm763_vm4, %vm764_vm3  ;;  %vm948_vm3 = vcmask 1047552   ;;  %vm949_vm4 = vsmask.f32 7424 }
 0x1ba   : > { %v760_v3 = vsub.f32 1.0, %v759_v2  ;;  %v3131_v2 = vld [vmem:[%s4071_s5 + $0x30] sm:$0xff] }
 0x1bb   : > { %1579 = vmatpush.bf16.msrb.mxu0 %v3131_v2  ;;  %v3158_v2 = vld [vmem:[%s4071_s5 + $0x108] sm:$0xff] }
 0x1bc   : > { %v761_v5 = vmul.f32 %v3299_v1, %v760_v3  ;;  %1626 = vmatpush.bf16.msrb.mxu2 %v3150_v62  ;;  %v3139_v3 = vld [vmem:[%s4071_s5 + $0x70] sm:$0xff]  ;;  %v3181_v62 = vld [vmem:[%s4071_s5 + $0x1c0] sm:$0xff] }
 0x1be   : > { %v762_v7 = vadd.f32 %v3299_v1, %v761_v5  ;;  %v3188_v5 = vld [vmem:[%s4071_s5 + $0x1f8] sm:$0xff] }
 0x1c0   : > { %v766_v9 = vsel %vm765_vm5, %v3299_v1, %v762_v7  ;;  %1627 = vmatpush.bf16.msrb.mxu2 %v3149_v63  ;;  %v3140_v1 = vld [vmem:[%s4071_s5 + $0x78] sm:$0xff]  ;;  %v3187_v7 = vld [vmem:[%s4071_s5 + $0x1f0] sm:$0xff]  ;;  %vm3755_vm5 = vmand %vm948_vm3, %vm949_vm4 }
 0x1c1   : > { %v771_v10 = vsel %vm768_vm6, %v770_v8, %v766_v9  ;;  %1592 = vmatpush.bf16.msrb.mxu1 %v3140_v1  ;;  %v3130_v8 = vld [vmem:[%s4071_s5 + $0x28] sm:$0xff]  ;;  %v3159_v63 = vld [vmem:[%s4071_s5 + $0x110] sm:$0xff]  ;;  %v3168_v1 = vld [vmem:[%s4071_s5 + $0x158] sm:$0xff]  ;;  %vm1734_vm6 = vcmask 517120  }
 0x1c2   : > { %v772_v11 = vmul.f32 %v3295_v51, %v771_v10  ;;  %v773_v12 = vmul.f32 %v3297_v52, %v771_v10  ;;  %v3138_v9 = vld [vmem:[%s4071_s5 + $0x68] sm:$0xff]  ;;  %1580 = vmatpush.bf16.msrb.mxu0 %v3130_v8 }
 0x1c3   : > { %v3166_v8 = vld [vmem:[%s4071_s5 + $0x148] sm:$0xff] }
 0x1c4   : > { %v774_v13 = vpack.c.bf16 %v773_v12, %v772_v11  ;;  %1676 = vmatpush.bf16.msra.mxu2 %v3188_v5  ;;  %v3146_v11 = vld [vmem:[%s4071_s5 + $0xa8] sm:$0xff]  ;;  %v3157_v5 = vld [vmem:[%s4071_s5 + $0x100] sm:$0xff] }
 0x1c5   : > { %1593 = vmatpush.bf16.msrb.mxu1 %v3139_v3  ;;  %v3186_v12 = vld [vmem:[%s4071_s5 + $0x1e8] sm:$0xff]  ;;  %1608 = vmatpush.bf16.msra.mxu3 %v3146_v11  ;;  %v3177_v3 = vld [vmem:[%s4071_s5 + $0x1a0] sm:$0xff] }
 0x1c6   : > { %2647 = vmatmul.msk.bf16.vlgmr.msra.gmra.mxu0 %vm578_vm2, %v774_v13  ;;  %v3129_v13 = vld [vmem:[%s4071_s5 + $0x20] sm:$0xff] }
 0x1c7   : > { %1581 = vmatpush.bf16.msrb.mxu0 %v3129_v13  ;;  %v3165_v11 = vld [vmem:[%s4071_s5 + $0x140] sm:$0xff]  ;;  %v3174_v13 = vld [vmem:[%s4071_s5 + $0x188] sm:$0xff] }
 0x1c8   : > { %1677 = vmatpush.bf16.msra.mxu2 %v3187_v7  ;;  %v3176_v7 = vld [vmem:[%s4071_s5 + $0x198] sm:$0xff] }
 0x1c9   : > { %1594 = vmatpush.bf16.msrb.mxu1 %v3138_v9  ;;  %v901_v9 = vand.u32 127, %v900_v6 }
 0x1cc   : > { %1678 = vmatpush.bf16.msra.mxu2 %v3186_v12  ;;  %v902_v12 = vand.u32 15, %v901_v9 }
 0x1ce   : > { %vm906_vm14 = vcmp.le.s32.totalorder %v902_v12, 14  ;;  %vm903_vm0 = vcmp.ge.s32.totalorder %v902_v12, 1 }
 0x1ef   : > { %v823_v14 = vpop.f32.mrf.mxu1 }
 0x1f0   : > { %v828_v16 = vsel %vm578_vm2, %v823_v14, -inf }
 0x1f7   : > { %v825_v15 = vpop.f32.mrf.mxu1 }
 0x1f8   : > { %v829_v17 = vsel %vm578_vm2, %v825_v15, -inf }
 0x1f9   : > { %v830_v18 = vmax.f32 %v828_v16, %v829_v17  ;;  %v3185_v16 = vld [vmem:[%s4071_s5 + $0x1e0] sm:$0xff]  ;;  %v3128_v17 = vld [vmem:[%s4071_s5 + $0x18] sm:$0xff] }
 0x1fa   : > { %1679 = vmatpush.bf16.msra.mxu2 %v3185_v16  ;;  %1582 = vmatpush.bf16.msrb.mxu0 %v3128_v17  ;;  %v3362_v17 = vmov 0.0  }
 0x1fb   : > { %v831_v19 = vrot.slane %v830_v18, 4 }
 0x1fd   : > { %v832_v20 = vmax.f32 %v830_v18, %v831_v19  ;;  %v3136_v18 = vld [vmem:[%s4071_s5 + $0x58] sm:$0xff] }
 0x1ff   : > { %v833_v21 = vrot.slane %v832_v20, 2 }
 0x201   : > { %v834_v22 = vmax.f32 %v832_v20, %v833_v21 }
 0x203   : > { %v835_v23 = vrot.slane %v834_v22, 1 }
 0x205   : > { %v836_v24 = vmax.f32 %v834_v22, %v835_v23  ;;  %v3144_v22 = vld [vmem:[%s4071_s5 + $0x98] sm:$0xff] }
 0x207   : > { %v837_v25 = vsub.f32 %v823_v14, %v836_v24  ;;  %v838_v26 = vsub.f32 %v825_v15, %v836_v24  ;;  %v3137_v14 = vld [vmem:[%s4071_s5 + $0x60] sm:$0xff]  ;;  %v3184_v24 = vld [vmem:[%s4071_s5 + $0x1d8] sm:$0xff] }
 0x208   : > { %v3145_v15 = vld [vmem:[%s4071_s5 + $0xa0] sm:$0xff]  ;;  %1595 = vmatpush.bf16.msrb.mxu1 %v3137_v14  ;;  %1680 = vmatpush.bf16.msra.mxu2 %v3184_v24 }
 0x209   : > { %v839_v27 = vmul.f32 1.442695, %v837_v25  ;;  %v841_v28 = vmul.f32 1.442695, %v838_v26  ;;  %1609 = vmatpush.bf16.msra.mxu3 %v3145_v15  ;;  %v3173_v14 = vld [vmem:[%s4071_s5 + $0x180] sm:$0xff] }
 0x20b   : > { %3300 = vpow2.f32 %v839_v27  ;;  %v3127_v27 = vld [vmem:[%s4071_s5 + $0x10] sm:$0xff] }
 0x20c   : > { %3302 = vpow2.f32 %v841_v28  ;;  %1596 = vmatpush.bf16.msrb.mxu1 %v3136_v18  ;;  %v3135_v28 = vld [vmem:[%s4071_s5 + $0x50] sm:$0xff]  ;;  %1583 = vmatpush.bf16.msrb.mxu0 %v3127_v27  ;;  %v907_v18 = vsel %vm906_vm14, 1.0, %v3362_v17 }
 0x20d   : > { %1610 = vmatpush.bf16.msra.mxu3 %v3144_v22  ;;  %1681 = vmatpush.bf16.msra.mxu2 %v3183_v53  ;;  %v3195_v53 = vld [vmem:[%s4071_s5 + $0x230] sm:$0xff] }
 0x210   : > { %1597 = vmatpush.bf16.msrb.mxu1 %v3135_v28 }
 0x211   : > { %v3301_v29 = vpop.eup %3300 }
 0x212   : > { %v3303_v30 = vpop.eup %3302  ;;  %v843_v31 = vsel %vm578_vm2, %v3301_v29, 0.0 }
 0x213   : > { %v844_v32 = vsel %vm578_vm2, %v3303_v30, 0.0 }
 0x214   : > { %v845_v33 = vadd.f32 %v844_v32, %v843_v31  ;;  %v3143_v31 = vld [vmem:[%s4071_s5 + $0x90] sm:$0xff] }
 0x215   : > { %1611 = vmatpush.bf16.msra.mxu3 %v3143_v31 }
 0x216   : > { %v846_v34 = vrot.slane %v845_v33, 4 }
 0x218   : > { %v847_v35 = vadd.f32 %v846_v34, %v845_v33  ;;  %v3126_v34 = vld [vmem:[%s4071_s5 + $0x8] sm:$0xff] }
 0x219   : > { %1584 = vmatpush.bf16.msrb.mxu0 %v3126_v34 }
 0x21a   : > { %v848_v36 = vrot.slane %v847_v35, 2 }
 0x21c   : > { %v849_v37 = vadd.f32 %v848_v36, %v847_v35  ;;  %v3134_v35 = vld [vmem:[%s4071_s5 + $0x48] sm:$0xff] }
 0x21d   : > { %1598 = vmatpush.bf16.msrb.mxu1 %v3134_v35 }
 0x21e   : > { %v850_v38 = vrot.slane %v849_v37, 1 }
 0x220   : > { %v851_v39 = vadd.f32 %v850_v38, %v849_v37  ;;  %v3142_v37 = vld [vmem:[%s4071_s5 + $0x88] sm:$0xff] }
 0x221   : > { %1612 = vmatpush.bf16.msra.mxu3 %v3142_v37 }
 0x222   : > { %3304 = vrcp.f32 %v851_v39  ;;  %v863_v43 = vand.u32 2147483648, %v851_v39  ;;  %v861_v45 = vand.u32 2147483647, %v851_v39  ;;  %vm857_vm8 = vweird.f32 %v851_v39 }
 0x224   : > { %v864_v47 = vor.u32 1.1754944e-38, %v863_v43  ;;  %vm862_vm10 = vcmp.eq.f32.partialorder %v861_v45, 8.507059e+37  ;;  %v3164_v43 = vld [vmem:[%s4071_s5 + $0x138] sm:$0xff] }
 0x225   : > { %1613 = vmatpush.bf16.msra.mxu3 %v3141_v54 }
 0x228   : > { %v3305_v40 = vpop.eup %3304 }
 0x229   : > { %v853_v41 = vmul.f32 %v3305_v40, %v851_v39  ;;  %vm858_vm7 = vweird.f32 %v3305_v40 }
 0x22a   : > { %vm859_vm9 = vmor %vm857_vm8, %vm858_vm7 }
 0x22b   : > { %v854_v42 = vsub.f32 1.0, %v853_v41  ;;  %v3133_v41 = vld [vmem:[%s4071_s5 + $0x40] sm:$0xff] }
 0x22c   : > { %1599 = vmatpush.bf16.msrb.mxu1 %v3133_v41 }
 0x22d   : > { %v855_v44 = vmul.f32 %v3305_v40, %v854_v42 }
 0x22f   : > { %v856_v46 = vadd.f32 %v3305_v40, %v855_v44  ;;  %v3172_v44 = vld [vmem:[%s4071_s5 + $0x178] sm:$0xff] }
 0x230   : > { %1648 = vmatpush.bf16.msra.mxu1 %v3172_v44 }
 0x231   : > { %v860_v48 = vsel %vm859_vm9, %v3305_v40, %v856_v46  ;;  %v3125_v40 = vld [vmem:[%s4071_s5] sm:$0xff] }
 0x232   : > { %v865_v49 = vsel %vm862_vm10, %v864_v47, %v860_v48  ;;  %1585 = vmatpush.bf16.msrb.mxu0 %v3125_v40  ;;  %v3189_v46 = vld [vmem:[%s4071_s5 + $0x200] sm:$0xff] }
 0x233   : > { %v866_v50 = vmul.f32 %v3301_v29, %v865_v49  ;;  %v867_v51 = vmul.f32 %v3303_v30, %v865_v49 }
 0x235   : > { %v868_v52 = vpack.c.bf16 %v867_v51, %v866_v50  ;;  %v3163_v50 = vld [vmem:[%s4071_s5 + $0x130] sm:$0xff]  ;;  %v3162_v51 = vld [vmem:[%s4071_s5 + $0x128] sm:$0xff] }
 0x236   : > { %1634 = vmatpush.bf16.msra.mxu0 %v3164_v43 }
 0x237   : > { %2649 = vmatmul.msk.bf16.vlgmr.msrb.gmra.mxu3 %vm578_vm2, %v868_v52  ;;  %v3171_v52 = vld [vmem:[%s4071_s5 + $0x170] sm:$0xff]  ;;  %vm916_vm2 = vcmask 7168  }
 0x238   : > { %1649 = vmatpush.bf16.msra.mxu1 %v3171_v52  ;;  %1662 = vmatpush.bf16.msrb.mxu3 %v3180_v56 }
 0x23a   : > { %1635 = vmatpush.bf16.msra.mxu0 %v3163_v50 }
 0x23c   : > { %1663 = vmatpush.bf16.msrb.mxu3 %v3179_v60 }
 0x23e   : > { %1636 = vmatpush.bf16.msra.mxu0 %v3162_v51 }
 0x240   : > { %1664 = vmatpush.bf16.msrb.mxu3 %v3178_v0 }
 0x242   : > { %1637 = vmatpush.bf16.msra.mxu0 %v3161_v55  ;;  %v3194_v55 = vld [vmem:[%s4071_s5 + $0x228] sm:$0xff] }
 0x243   : > { %v787_v10 = vpop.f32.mrf.mxu0 }
 0x244   : > { %1665 = vmatpush.bf16.msrb.mxu3 %v3177_v3 }
 0x248   : > { %1666 = vmatpush.bf16.msrb.mxu3 %v3176_v7 }
 0x24b   : > { %v789_v23 = vpop.f32.mrf.mxu0 }
 0x2ba   : > { %v882_v57 = vpop.f32.mrf.mxu3 }
 0x2c2   : > { %v884_v58 = vpop.f32.mrf.mxu3 }
 0x2c3   : > { %v3288_v59 = vpack.i.bf16 %v884_v58, %v882_v57  ;;  %v3170_v57 = vld [vmem:[%s4071_s5 + $0x168] sm:$0xff] }
 0x2c4   : > { %v3182_v58 = vld [vmem:[%s4071_s5 + $0x1c8] sm:$0xff]  ;;  %1650 = vmatpush.bf16.msra.mxu1 %v3170_v57 }
 0x2c5   : > { %3289 = vrot.lane.b32.xlu2 %v3288_v59, %s3359_s17  ;;  %s3360_s17 = smov 127   ;;  %1682 = vmatpush.bf16.msra.mxu2 %v3182_v58  ;;  %v3160_v59 = vld [vmem:[%s4071_s5 + $0x118] sm:$0xff]  ;;  %v3193_v58 = vld [vmem:[%s4071_s5 + $0x220] sm:$0xff] }
 0x2c6   : > { %1638 = vmatpush.bf16.msra.mxu0 %v3160_v59 }
 0x2c8   : > { %1651 = vmatpush.bf16.msra.mxu1 %v3169_v61  ;;  %v3192_v61 = vld [vmem:[%s4071_s5 + $0x218] sm:$0xff] }
 0x2c9   : > { %1683 = vmatpush.bf16.msra.mxu2 %v3181_v62 }
 0x2ca   : > { %1639 = vmatpush.bf16.msra.mxu0 %v3159_v63  ;;  %v3190_v63 = vld [vmem:[%s4071_s5 + $0x208] sm:$0xff] }
 0x2cc   : > { %1652 = vmatpush.bf16.msra.mxu1 %v3168_v1 }
 0x2ce   : > { %1640 = vmatpush.bf16.msra.mxu0 %v3158_v2 }
 0x2d0   : > { %1653 = vmatpush.bf16.msra.mxu1 %v3167_v4  ;;  %v3293_v4 = vld [vmem:[%s4072_s6] ss:$0 sm:$0xff] }
 0x2d2   : > { %1641 = vmatpush.bf16.msra.mxu0 %v3157_v5 }
 0x2d4   : > { %1654 = vmatpush.bf16.msra.mxu1 %v3166_v8 }
 0x2d8   : > { %1655 = vmatpush.bf16.msra.mxu1 %v3165_v11 }
 0x31f   : > { %v3290_v19 = vpop.permute.xlu2 %3289 }
 0x320   : > { %v3292_v20 = vunpack.i.h.bf16 %v3290_v19  ;;  %v3291_v21 = vunpack.i.l.bf16 %v3290_v19 }
 0x322   : > { %v896_v25 = vsel %vm670_vm1, %v789_v23, %v3292_v20  ;;  %v895_v26 = vsel %vm670_vm1, %v787_v10, %v3291_v21  ;;  %v3175_v10 = vld [vmem:[%s4071_s5 + $0x190] sm:$0xff]  ;;  %v904_v20 = vsel %vm903_vm0, 1.0, %v3362_v17 }
 0x323   : > { %v898_v29 = vpack.c.bf16 %v896_v25, %v896_v25  ;;  %v897_v30 = vpack.c.bf16 %v895_v26, %v895_v26  ;;  %1667 = vmatpush.bf16.msrb.mxu3 %v3175_v10 }
 0x325   : > { %v912_v32 = vunpack.c.l.b16 %v898_v29  ;;  %v911_v33 = vunpack.c.l.b16 %v897_v30 }
 0x327   : > { %v3644_v36 = vpack.c.b16 %v912_v32, %v911_v33  ;;  %1668 = vmatpush.bf16.msrb.mxu3 %v3174_v13 }
 0x329   : > { %965 = vrot.lane.b32.xlu1 %v3644_v36, %s3360_s17  ;;  %914 = vrot.lane.b32.xlu0 %v3644_v36, %s3361_s22  ;;  %v953_v38 = vshrl.u32 %v3644_v36, 16  ;;  %v956_v39 = vshll.u32 %v3644_v36, 16 }
 0x32b   : > { %v955_v42 = vrot.slane %v953_v38, 7  ;;  %v961_v45 = vrot.slane %v956_v39, 1  ;;  %1669 = vmatpush.bf16.msrb.mxu3 %v3173_v14 }
 0x32d   : > { %v958_v47 = vor.u32 %v956_v39, %v955_v42  ;;  %v3670_v48 = vor.u32 %v961_v45, %v953_v38 }
 0x32f   : > { %v960_v49 = vsel %vm3666_vm13, 0, %v958_v47  ;;  %v964_v57 = vsel %vm3755_vm5, %v3670_v48, 0  ;;  %v3191_v48 = vld [vmem:[%s4071_s5 + $0x210] sm:$0xff] }
 0x330   : > { %1628 = vmatmul.bf16.vlgmr.msrb.gmra.mxu2 %v960_v49  ;;  %v3196_v49 = vld [vmem:[%s4071_s5 + $0x238] sm:$0xff] }
 0x39b   : > { %v966_v15 = vpop.permute.xlu1 %965  ;;  %v915_v16 = vpop.permute.xlu0 %914 }
 0x39c   : > { %v969_v19 = vsel %vm967_vm15, %v966_v15, 0  ;;  %v919_v21 = vsel %vm916_vm2, 0, %v915_v16 }
 0x39d   : > { %v971_v22 = vunpack.c.l.bf16 %v969_v19  ;;  %v972_v23 = vunpack.c.h.bf16 %v969_v19  ;;  %v921_v24 = vunpack.c.l.bf16 %v919_v21  ;;  %v922_v25 = vunpack.c.h.bf16 %v919_v21 }
 0x39f   : > { %v974_v26 = vmul.f32 %v971_v22, %v907_v18  ;;  %v975_v27 = vmul.f32 %v972_v23, %v907_v18  ;;  %v924_v28 = vmul.f32 %v921_v24, %v904_v20  ;;  %v925_v29 = vmul.f32 %v922_v25, %v904_v20 }
 0x3a1   : > { %v976_v30 = vpack.c.bf16 %v974_v26, %v974_v26  ;;  %v977_v31 = vpack.c.bf16 %v975_v27, %v975_v27  ;;  %v926_v32 = vpack.c.bf16 %v924_v28, %v924_v28  ;;  %v927_v33 = vpack.c.bf16 %v925_v29, %v925_v29 }
 0x3a3   : > { %v980_v34 = vunpack.c.l.b16 %v976_v30  ;;  %v981_v35 = vunpack.c.l.b16 %v977_v31  ;;  %v930_v37 = vunpack.c.l.b16 %v926_v32  ;;  %v931_v38 = vunpack.c.l.b16 %v927_v33 }
 0x3a5   : > { %v982_v39 = vpack.c.b16 %v981_v35, %v980_v34  ;;  %v932_v40 = vpack.c.b16 %v931_v38, %v930_v37 }
 0x3a7   : > { %1600 = vmatmul.bf16.vlgmr.msrb.gmra.mxu1 %v932_v40  ;;  %1684 = vmatmul.bf16.vlgmr.msra.gmra.mxu2 %v982_v39  ;;  %v934_v41 = vshrl.u32 %v932_v40, 16  ;;  %v937_v42 = vshll.u32 %v932_v40, 16  ;;  %v984_v54 = vshrl.u32 %v982_v39, 16  ;;  %v987_v59 = vshll.u32 %v982_v39, 16 }
 0x3a9   : > { %v936_v43 = vrot.slane %v934_v41, 7  ;;  %v945_v44 = vrot.slane %v937_v42, 1  ;;  %v986_v56 = vrot.slane %v984_v54, 7  ;;  %v992_v0 = vrot.slane %v987_v59, 1 }
 0x3ab   : > { %v939_v45 = vor.u32 %v937_v42, %v936_v43  ;;  %v946_v47 = vor.u32 %v945_v44, %v934_v41  ;;  %v989_v60 = vor.u32 %v987_v59, %v986_v56  ;;  %v993_v1 = vor.u32 %v992_v0, %v984_v54 }
 0x3ad   : > { %v944_v51 = vsel %vm3666_vm13, 0, %v939_v45  ;;  %v951_v52 = vsel %vm3755_vm5, %v946_v47, 0  ;;  %v991_v62 = vsel %vm3666_vm13, 0, %v989_v60 }
 0x3ae   : > { %1586 = vmatmul.bf16.vlgmr.msrb.gmra.mxu0 %v944_v51  ;;  %1614 = vmatmul.bf16.vlgmr.msra.gmra.mxu3 %v951_v52 }
 0x3af   : > { %1690 = vmatpush.bf16.msrb.mxu0 %v3196_v49 }
 0x3b3   : > { %1691 = vmatpush.bf16.msrb.mxu0 %v3195_v53  ;;  %v1629_v8 = vpop.f32.mrf.mxu2 }
 0x3b7   : > { %1656 = vmatmul.bf16.vlgmr.msra.gmra.mxu1 %v964_v57  ;;  %1692 = vmatpush.bf16.msrb.mxu0 %v3194_v55 }
 0x3bb   : > { %1693 = vmatpush.bf16.msrb.mxu0 %v3193_v58  ;;  %v1631_v16 = vpop.f32.mrf.mxu2 }
 0x3be   : > { %1642 = vmatmul.bf16.vlgmr.msra.gmra.mxu0 %v3644_v36  ;;  %1670 = vmatmul.bf16.vlgmr.msrb.gmra.mxu3 %v991_v62  ;;  %v995_v36 = vsel %vm3755_vm5, %v993_v1, 0  ;;  %v1710_v62 = vld [vmem:[#allocation3] sm:$0x3] }
 0x3bf   : > { %1694 = vmatpush.bf16.msrb.mxu0 %v3192_v61 }
 0x3c3   : > { %1695 = vmatpush.bf16.msrb.mxu0 %v3191_v48 }
 0x3c7   : > { %1696 = vmatpush.bf16.msrb.mxu0 %v3190_v63 }
 0x3cb   : > { %1697 = vmatpush.bf16.msrb.mxu0 %v3189_v46 }
 0x3ce   : > { %1698 = vmatmul.bf16.vlgmr.msrb.gmra.mxu0 %v995_v36 }
 0x424   : > { %v1601_v3 = vpop.f32.mrf.mxu1 }
 0x42a   : > { %v1685_v26 = vpop.f32.mrf.mxu2 }
 0x42b   : > { %v1587_v2 = vpop.f32.mrf.mxu0 }
 0x42c   : > { %v1588_v7 = vadd.f32 %v3293_v4, %v1587_v2  ;;  %v1603_v9 = vpop.f32.mrf.mxu1 }
 0x42e   : > { %v1602_v10 = vadd.f32 %v1601_v3, %v1588_v7 }
 0x431   : > { %v1615_v5 = vpop.f32.mrf.mxu3 }
 0x432   : > { %v1616_v12 = vadd.f32 %v1615_v5, %v1602_v10  ;;  %v1687_v37 = vpop.f32.mrf.mxu2 }
 0x433   : > { %v1589_v6 = vpop.f32.mrf.mxu0 }
 0x434   : > { %v1590_v14 = vadd.f32 %v3293_v4, %v1589_v6  ;;  %v1630_v15 = vadd.f32 %v1629_v8, %v1616_v12  ;;  %v1657_v17 = vpop.f32.mrf.mxu1 }
 0x436   : > { %v1604_v18 = vadd.f32 %v1603_v9, %v1590_v14 }
 0x439   : > { %v1617_v11 = vpop.f32.mrf.mxu3 }
 0x43a   : > { %v1618_v21 = vadd.f32 %v1617_v11, %v1604_v18 }
 0x43b   : > { %v1643_v13 = vpop.f32.mrf.mxu0 }
 0x43c   : > { %v1644_v19 = vadd.f32 %v1643_v13, %v1630_v15  ;;  %v1632_v25 = vadd.f32 %v1631_v16, %v1618_v21  ;;  %v1659_v28 = vpop.f32.mrf.mxu1 }
 0x43e   : > { %v1658_v23 = vadd.f32 %v1657_v17, %v1644_v19 }
 0x441   : > { %v1671_v20 = vpop.f32.mrf.mxu3 }
 0x442   : > { %v1672_v24 = vadd.f32 %v1671_v20, %v1658_v23 }
 0x443   : > { %v1645_v22 = vpop.f32.mrf.mxu0 }
 0x444   : > { %v1646_v27 = vadd.f32 %v1645_v22, %v1632_v25  ;;  %v1686_v29 = vadd.f32 %v1685_v26, %v1672_v24 }
 0x446   : > { %v1660_v32 = vadd.f32 %v1659_v28, %v1646_v27 }
 0x449   : > { %v1673_v30 = vpop.f32.mrf.mxu3 }
 0x44a   : > { %v1674_v34 = vadd.f32 %v1673_v30, %v1660_v32 }
 0x44b   : > { %v1699_v31 = vpop.f32.mrf.mxu0 }
 0x44c   : > { %v1700_v33 = vadd.f32 %v1699_v31, %v1686_v29  ;;  %v1688_v38 = vadd.f32 %v1687_v37, %v1674_v34 }
 0x44e   : > { %v1704_v35 = vmax.f32 %v1700_v33, 0.0 }
 0x450   : > { %1708 = vst.msk [vmem:[%s1707_s26] sm:$0xff] %vm670_vm1, %v1704_v35  ;;  %v1720_v41 = vmul.f32 %v1704_v35, %v1704_v35  ;;  %v1711_v43 = vsel %vm670_vm1, %v1704_v35, 0.0 }
 0x452   : > { %v1722_v49 = vsel %vm670_vm1, %v1720_v41, 0.0 }
 0x453   : > { %v1701_v39 = vpop.f32.mrf.mxu0 }
 0x454   : > { %v1702_v40 = vadd.f32 %v1701_v39, %v1688_v38 }
 0x456   : > { %v1705_v42 = vmax.f32 %v1702_v40, 0.0 }
 0x458   : > { %1709 = vst.msk [vmem:[%s1707_s26 + $0x8] sm:$0xff] %vm670_vm1, %v1705_v42  ;;  %v1712_v44 = vsel %vm670_vm1, %v1705_v42, 0.0  ;;  %v1721_v45 = vmul.f32 %v1705_v42, %v1705_v42 }
 0x459   : > { %v1713_v47 = vadd.f32 %v1712_v44, %v1711_v43 }
 0x45a   : > { %v1723_v50 = vsel %vm670_vm1, %v1721_v45, 0.0 }
 0x45b   : > { %v1714_v51 = vrot.slane %v1713_v47, 4  ;;  %v1724_v52 = vadd.f32 %v1723_v50, %v1722_v49 }
 0x45d   : > { %v1715_v53 = vadd.f32 %v1714_v51, %v1713_v47  ;;  %v1725_v54 = vrot.slane %v1724_v52, 4 }
 0x45f   : > { %v1716_v55 = vrot.slane %v1715_v53, 2  ;;  %v1726_v56 = vadd.f32 %v1725_v54, %v1724_v52 }
 0x461   : > { %v1717_v57 = vadd.f32 %v1716_v55, %v1715_v53  ;;  %v1727_v58 = vrot.slane %v1726_v56, 2 }
 0x463   : > { %v1718_v59 = vrot.slane %v1717_v57, 1  ;;  %v1728_v60 = vadd.f32 %v1727_v58, %v1726_v56 }
 0x465   : > { %v1729_v61 = vrot.slane %v1728_v60, 1  ;;  %v1719_v48 = vadd.f32 %v1718_v59, %v1717_v57 }
 0x467   : > { %v1730_v63 = vadd.f32 %v1729_v61, %v1728_v60 }
 0x469   : > { %v1732_v0 = vsel %vm941_vm11, %v1719_v48, %v1730_v63 }
 0x46a   : > { %v1733_v46 = vadd.f32 %v1732_v0, %v1710_v62 }
 0x46c   : > { %1735 = vst.msk [vmem:[#allocation3] sm:$0x3] %vm1734_vm6, %v1733_v46 }
 0x46d PF: > { %p2939_p8 = scmp.ne.s32.totalorder %s3343_s19, 1 }
 0x46e   : > { %p2940_p9 = scmp.ne.s32.totalorder (!%p2939_p8), %s3339_s18, 0 }
 0x46f   : > { %1739 = sbr.rel (%p2939_p8) target bundleno = 1760 (0x6e0), region = 92 }
 0x474   : > { %1743 = sbr.rel (%p2940_p9) target bundleno = 1147 (0x47b), region = 96 }
 0x479   : > { %vm1745_vm1 = vcmask 517120   ;;  %v3363_v1 = vmov 0.0  }
 0x47a   : > { %1746 = vst.msk [vmem:[#allocation3 + $0x2] sm:$0x3] %vm1745_vm1, %v3363_v1 }
 0x47b PF: > { %v1761_v36 = vld [vmem:[%s4080_s14 + $0x38] sm:$0xff]  ;;  %v1760_v2 = vld [vmem:[%s4080_s14 + $0x30] sm:$0xff]  ;;  %v1759_v3 = vld [vmem:[%s4080_s14 + $0x28] sm:$0xff]  ;;  %vm1762_vm7 = vcmask 523264   ;;  %s2941_s20 = sshll.u32 %s3339_s18, 4  ;;  %s3364_s22 = smov 1   ;;  %v1825_v48 = vlaneseq }
 0x47c   : > { %1774 = vmatpush.msra.mxu0 %v1761_v36  ;;  %v1758_v4 = vld [vmem:[%s4080_s14 + $0x20] sm:$0xff]  ;;  %v1757_v5 = vld [vmem:[%s4080_s14 + $0x18] sm:$0xff]  ;;  %v1756_v6 = vld [vmem:[%s4080_s14 + $0x10] sm:$0xff]  ;;  %s3843_s26 = scalar_lea.vmem [#allocation2], %s2941_s20  ;;  %vm1873_vm11 = vcmask 1047552   ;;  %s3365_s27 = smov 64  }
 0x47d   : > { %v1755_v7 = vld [vmem:[%s4080_s14 + $0x8] sm:$0xff]  ;;  %v1754_v8 = vld [vmem:[%s4080_s14] sm:$0xff]  ;;  %v3220_v22 = vld [vmem:[%s4075_s9 + $0xb8] sm:$0xff]  ;;  %vm1874_vm12 = vsmask.f32 7424  ;;  %s3366_s28 = smov 127  }
 0x47e   : > { %1775 = vmatpush.msra.mxu0 %v1760_v2  ;;  %v1751_v9 = vld [vmem:[#allocation3] sm:$0x3]  ;;  %2268 = vmatpush.bf16.msra.mxu3 %v3220_v22  ;;  %v3219_v24 = vld [vmem:[%s4075_s9 + $0xb0] sm:$0xff]  ;;  %v1752_v26 = vld [vmem:[%s4073_s7] sm:$0x1]  ;;  %v1826_v46 = vand.u32 127, %v1825_v48 }
 0x47f   : > { %v3218_v25 = vld [vmem:[%s4075_s9 + $0xa8] sm:$0xff]  ;;  %v1749_v28 = vld [vmem:[%s3843_s26] sm:$0xff]  ;;  %v3216_v40 = vld [vmem:[%s4075_s9 + $0x98] sm:$0xff]  ;;  %vm1841_vm15 = vcmask 7168   ;;  %vm1892_vm2 = vcmask 515072   ;;  %vm1866_vm3 = vcmask 1040384  }
 0x480   : > { %1776 = vmatpush.msra.mxu0 %v1759_v3  ;;  %v1750_v29 = vld [vmem:[%s3843_s26 + $0x8] sm:$0xff]  ;;  %v3217_v32 = vld [vmem:[%s4075_s9 + $0xa0] sm:$0xff]  ;;  %v3215_v45 = vld [vmem:[%s4075_s9 + $0x90] sm:$0xff]  ;;  %vm1867_vm4 = vsmask.f32 256  ;;  %vm2339_vm6 = vcmask 517120  }
 0x481   : > { %v3306_v37 = vld [vmem:[%s4074_s8] ss:$0 sm:$0xff]  ;;  %v3214_v51 = vld [vmem:[%s4075_s9 + $0x88] sm:$0xff]  ;;  %vm3865_vm13 = vmand %vm1873_vm11, %vm1874_vm12 }
 0x482   : > { %1777 = vmatpush.msra.mxu0 %v1758_v4  ;;  %2269 = vmatpush.bf16.msra.mxu3 %v3219_v24  ;;  %v3213_v55 = vld [vmem:[%s4075_s9 + $0x80] sm:$0xff]  ;;  %v3228_v63 = vld [vmem:[%s4075_s9 + $0xf8] sm:$0xff]  ;;  %v3227_v1 = vld [vmem:[%s4075_s9 + $0xf0] sm:$0xff]  ;;  %v1827_v4 = vand.u32 15, %v1826_v46 }
 0x483   : > { %v3204_v0 = vld [vmem:[%s4075_s9 + $0x38] sm:$0xff]  ;;  %v3203_v36 = vld [vmem:[%s4075_s9 + $0x30] sm:$0xff]  ;;  %vm3922_vm5 = vmand %vm1866_vm3, %vm1867_vm4 }
 0x484   : > { %1778 = vmatpush.msra.mxu0 %v1757_v5  ;;  %2240 = vmatpush.bf16.msra.mxu1 %v3204_v0  ;;  %v3212_v2 = vld [vmem:[%s4075_s9 + $0x78] sm:$0xff]  ;;  %v3211_v3 = vld [vmem:[%s4075_s9 + $0x70] sm:$0xff]  ;;  %v3226_v5 = vld [vmem:[%s4075_s9 + $0xe8] sm:$0xff]  ;;  %vm1828_vm14 = vcmp.ge.s32.totalorder %v1827_v4, 1  ;;  %vm1831_vm0 = vcmp.le.s32.totalorder %v1827_v4, 14 }
 0x485   : > { %2254 = vmatpush.bf16.msra.mxu2 %v3212_v2 }
 0x486   : > { %1779 = vmatpush.msra.mxu0 %v1756_v6  ;;  %2270 = vmatpush.bf16.msra.mxu3 %v3218_v25  ;;  %v3202_v6 = vld [vmem:[%s4075_s9 + $0x28] sm:$0xff] }
 0x488   : > { %1780 = vmatpush.msra.mxu0 %v1755_v7  ;;  %2241 = vmatpush.bf16.msra.mxu1 %v3203_v36  ;;  %v3225_v7 = vld [vmem:[%s4075_s9 + $0xe0] sm:$0xff] }
 0x489   : > { %2255 = vmatpush.bf16.msra.mxu2 %v3211_v3 }
 0x48a   : > { %1781 = vmatpush.msra.mxu0 %v1754_v8  ;;  %2271 = vmatpush.bf16.msra.mxu3 %v3217_v32  ;;  %v3201_v8 = vld [vmem:[%s4075_s9 + $0x20] sm:$0xff] }
 0x48b   : > { %2942 = vmatmul.msk.f32.vlgmr.msra.gmra.mxu0 %vm1762_vm7, %v1751_v9 }
 0x48c   : > { %2282 = vmatpush.bf16.msrb.mxu0 %v3228_v63  ;;  %2242 = vmatpush.bf16.msra.mxu1 %v3202_v6 }
 0x48e   : > { %2272 = vmatpush.bf16.msra.mxu3 %v3216_v40 }
 0x490   : > { %2283 = vmatpush.bf16.msrb.mxu0 %v3227_v1  ;;  %2243 = vmatpush.bf16.msra.mxu1 %v3201_v8 }
 0x492   : > { %2273 = vmatpush.bf16.msra.mxu3 %v3215_v45  ;;  %v3198_v45 = vld [vmem:[%s4075_s9 + $0x8] sm:$0xff] }
 0x494   : > { %2284 = vmatpush.bf16.msrb.mxu0 %v3226_v5 }
 0x496   : > { %2274 = vmatpush.bf16.msra.mxu3 %v3214_v51  ;;  %v3206_v51 = vld [vmem:[%s4075_s9 + $0x48] sm:$0xff] }
 0x498   : > { %2285 = vmatpush.bf16.msrb.mxu0 %v3225_v7 }
 0x49a   : > { %2275 = vmatpush.bf16.msra.mxu3 %v3213_v55 }
 0x508   : > { %v1783_v10 = vpop.f32.mrf.mxu0 }
 0x509   : > { %v1786_v11 = vmul.f32 0.001953125, %v1783_v10  ;;  %v3367_v10 = vmov 0.0  }
 0x50a   : > { %v1832_v24 = vsel %vm1831_vm0, 1.0, %v3367_v10 }
 0x50b   : > { %v1787_v12 = vmul.f32 %v1786_v11, %v1786_v11  ;;  %v1809_v27 = vperm.slane %v1786_v11, 0 }
 0x50d   : > { %v1789_v13 = vrot.slane %v1787_v12, 7  ;;  %v1810_v33 = vsub.f32 %v1749_v28, %v1809_v27  ;;  %v1811_v34 = vsub.f32 %v1750_v29, %v1809_v27  ;;  %v3222_v29 = vld [vmem:[%s4075_s9 + $0xc8] sm:$0xff] }
 0x50f   : > { %v1791_v14 = vsub.f32 %v1786_v11, %v1789_v13  ;;  %v1829_v11 = vsel %vm1828_vm14, 1.0, %v3367_v10 }
 0x511   : > { %v1792_v15 = vadd.f32 1e-05, %v1791_v14 }
 0x513   : > { %3308 = vrsqrt.f32 %v1792_v15  ;;  %vm1799_vm9 = vweird.f32 %v1792_v15 }
 0x519   : > { %v3309_v16 = vpop.eup %3308 }
 0x51a   : > { %v1794_v17 = vmul.f32 %v3309_v16, %v1792_v15  ;;  %vm1800_vm8 = vweird.f32 %v3309_v16  ;;  %v3224_v15 = vld [vmem:[%s4075_s9 + $0xd8] sm:$0xff] }
 0x51b   : > { %vm1801_vm10 = vmor %vm1799_vm9, %vm1800_vm8  ;;  %2286 = vmatpush.bf16.msrb.mxu0 %v3224_v15  ;;  %v3307_v15 = vld [vmem:[%s4076_s10] ss:$0 sm:$0xff] }
 0x51c   : > { %v1795_v18 = vmul.f32 %v3309_v16, %v1794_v17 }
 0x51e   : > { %v1796_v19 = vmul.f32 0.5, %v1795_v18 }
 0x520   : > { %v1797_v20 = vsub.f32 1.5, %v1796_v19 }
 0x522   : > { %v1798_v21 = vmul.f32 %v3309_v16, %v1797_v20  ;;  %v3223_v20 = vld [vmem:[%s4075_s9 + $0xd0] sm:$0xff] }
 0x523   : > { %2287 = vmatpush.bf16.msrb.mxu0 %v3223_v20 }
 0x524   : > { %v1802_v23 = vsel %vm1801_vm10, %v3309_v16, %v1798_v21 }
 0x525   : > { %1804 = vst [vmem:[#allocation1] sm:$0xff] %v1802_v23 }
 0x527   : > { %2288 = vmatpush.bf16.msrb.mxu0 %v3222_v29 }
 0x52c   : > { %v1806_v30 = vld [vmem:[#allocation1 + $0x1] ss:$9 sm:$0xff] }
 0x52d   : > { %v1808_v31 = vmul.f32 %v1806_v30, %v1752_v26 }
 0x52f   : > { %v1813_v35 = vperm.slane %v1808_v31, 0 }
 0x531   : > { %v1815_v38 = vmul.f32 %v1813_v35, %v1810_v33  ;;  %v1816_v39 = vmul.f32 %v1813_v35, %v1811_v34  ;;  %v3221_v34 = vld [vmem:[%s4075_s9 + $0xc0] sm:$0xff] }
 0x532   : > { %2289 = vmatpush.bf16.msrb.mxu0 %v3221_v34 }
 0x533   : > { %v1820_v41 = vadd.f32 %v3306_v37, %v1815_v38  ;;  %v1821_v42 = vadd.f32 %v3306_v37, %v1816_v39 }
 0x535   : > { %v1822_v43 = vpack.c.bf16 %v1820_v41, %v1820_v41  ;;  %v1823_v44 = vpack.c.bf16 %v1821_v42, %v1821_v42  ;;  %v3200_v41 = vld [vmem:[%s4075_s9 + $0x18] sm:$0xff]  ;;  %v3210_v42 = vld [vmem:[%s4075_s9 + $0x68] sm:$0xff] }
 0x536   : > { %2244 = vmatpush.bf16.msra.mxu1 %v3200_v41  ;;  %2256 = vmatpush.bf16.msra.mxu2 %v3210_v42 }
 0x537   : > { %v1836_v47 = vunpack.c.l.b16 %v1822_v43  ;;  %v1837_v49 = vunpack.c.l.b16 %v1823_v44  ;;  %v3199_v43 = vld [vmem:[%s4075_s9 + $0x10] sm:$0xff]  ;;  %v3209_v44 = vld [vmem:[%s4075_s9 + $0x60] sm:$0xff] }
 0x539   : > { %v1838_v50 = vpack.c.b16 %v1837_v49, %v1836_v47  ;;  %v3208_v47 = vld [vmem:[%s4075_s9 + $0x58] sm:$0xff]  ;;  %v3197_v49 = vld [vmem:[%s4075_s9] sm:$0xff] }
 0x53a   : > { %2245 = vmatpush.bf16.msra.mxu1 %v3199_v43  ;;  %2257 = vmatpush.bf16.msra.mxu2 %v3209_v44 }
 0x53b   : > { %1839 = vrot.lane.b32.xlu0 %v1838_v50, %s3364_s22  ;;  %v1878_v52 = vshrl.u32 %v1838_v50, 16  ;;  %v1881_v53 = vshll.u32 %v1838_v50, 16 }
 0x53d   : > { %v1886_v54 = vrot.slane %v1881_v53, 1  ;;  %v1880_v56 = vrot.slane %v1878_v52, 7 }
 0x53e   : > { %2246 = vmatpush.bf16.msra.mxu1 %v3198_v45  ;;  %2258 = vmatpush.bf16.msra.mxu2 %v3208_v47 }
 0x53f   : > { %v1887_v58 = vor.u32 %v1886_v54, %v1878_v52  ;;  %v3869_v59 = vor.u32 %v1881_v53, %v1880_v56  ;;  %v3232_v52 = vld [vmem:[%s4075_s9 + $0x118] sm:$0xff]  ;;  %v3205_v53 = vld [vmem:[%s4075_s9 + $0x40] sm:$0xff]  ;;  %v3231_v54 = vld [vmem:[%s4075_s9 + $0x110] sm:$0xff] }
 0x541   : > { %v1889_v60 = vsel %vm3865_vm13, %v1887_v58, 0  ;;  %v1885_v40 = vsel %vm3922_vm5, 0, %v3869_v59  ;;  %v3230_v58 = vld [vmem:[%s4075_s9 + $0x108] sm:$0xff] }
 0x542   : > { %1927 = vrot.lane.b32.xlu2 %v1889_v60, %s3365_s27  ;;  %2247 = vmatpush.bf16.msra.mxu1 %v3197_v49  ;;  %v3229_v60 = vld [vmem:[%s4075_s9 + $0x100] sm:$0xff] }
 0x543   : > { %1890 = vrot.lane.b32.xlu0 %v1838_v50, %s3366_s28 }
 0x546   : > { %2300 = vmatpush.bf16.msrb.mxu1 %v3232_v52 }
 0x54a   : > { %2301 = vmatpush.bf16.msrb.mxu1 %v3231_v54 }
 0x54e   : > { %2302 = vmatpush.bf16.msrb.mxu1 %v3230_v58 }
 0x552   : > { %2303 = vmatpush.bf16.msrb.mxu1 %v3229_v60 }
 0x59c   : > { %v1928_v61 = vpop.permute.xlu2 %1927 }
 0x59d   : > { %v1940_v62 = vsel %vm1762_vm7, %v1838_v50, %v1928_v61  ;;  %v3207_v50 = vld [vmem:[%s4075_s9 + $0x50] sm:$0xff] }
 0x59e   : > { %2276 = vmatmul.bf16.vlgmr.msra.gmra.mxu3 %v1940_v62  ;;  %2259 = vmatpush.bf16.msra.mxu2 %v3207_v50 }
 0x5a2   : > { %2260 = vmatpush.bf16.msra.mxu2 %v3206_v51 }
 0x5a6   : > { %2261 = vmatpush.bf16.msra.mxu2 %v3205_v53 }
 0x5ad   : > { %v1840_v9 = vpop.permute.xlu0 %1839 }
 0x5ae   : > { %v1844_v12 = vsel %vm1841_vm15, 0, %v1840_v9 }
 0x5af   : > { %v1846_v13 = vunpack.c.l.bf16 %v1844_v12  ;;  %v1847_v14 = vunpack.c.h.bf16 %v1844_v12 }
 0x5b1   : > { %v1849_v16 = vmul.f32 %v1846_v13, %v1829_v11  ;;  %v1850_v17 = vmul.f32 %v1847_v14, %v1829_v11 }
 0x5b3   : > { %v1851_v18 = vpack.c.bf16 %v1849_v16, %v1849_v16  ;;  %v1852_v19 = vpack.c.bf16 %v1850_v17, %v1850_v17 }
 0x5b5   : > { %v1855_v21 = vunpack.c.l.b16 %v1851_v18  ;;  %v1856_v22 = vunpack.c.l.b16 %v1852_v19  ;;  %v1891_v23 = vpop.permute.xlu0 %1890 }
 0x5b6   : > { %v1894_v25 = vsel %vm1892_vm2, %v1891_v23, 0 }
 0x5b7   : > { %v1896_v26 = vunpack.c.l.bf16 %v1894_v25  ;;  %v1897_v27 = vunpack.c.h.bf16 %v1894_v25  ;;  %v3911_v28 = vpack.c.b16 %v1856_v22, %v1855_v21 }
 0x5b9   : > { %v1899_v30 = vmul.f32 %v1896_v26, %v1832_v24  ;;  %v1900_v31 = vmul.f32 %v1897_v27, %v1832_v24  ;;  %1921 = vrot.lane.b32.xlu1 %v3911_v28, %s3365_s27  ;;  %v1859_v0 = vshrl.u32 %v3911_v28, 16  ;;  %v1862_v1 = vshll.u32 %v3911_v28, 16 }
 0x5bb   : > { %v1901_v32 = vpack.c.bf16 %v1899_v30, %v1899_v30  ;;  %v1902_v33 = vpack.c.bf16 %v1900_v31, %v1900_v31  ;;  %v1861_v46 = vrot.slane %v1859_v0, 7  ;;  %v1870_v4 = vrot.slane %v1862_v1, 1 }
 0x5bd   : > { %v1905_v35 = vunpack.c.l.b16 %v1901_v32  ;;  %v1906_v37 = vunpack.c.l.b16 %v1902_v33  ;;  %v1864_v36 = vor.u32 %v1862_v1, %v1861_v46  ;;  %v1871_v6 = vor.u32 %v1870_v4, %v1859_v0 }
 0x5bf   : > { %v1907_v39 = vpack.c.b16 %v1906_v37, %v1905_v35  ;;  %v1869_v3 = vsel %vm3922_vm5, 0, %v1864_v36  ;;  %v1876_v8 = vsel %vm3865_vm13, %v1871_v6, 0 }
 0x5c1   : > { %1929 = vrot.lane.b32.xlu2 %v1907_v39, %s3365_s27  ;;  %1924 = vrot.lane.b32.xlu1 %v1885_v40, %s3365_s27  ;;  %v1909_v55 = vshrl.u32 %v1907_v39, 16  ;;  %v1912_v59 = vshll.u32 %v1907_v39, 16 }
 0x5c3   : > { %v1911_v56 = vrot.slane %v1909_v55, 7  ;;  %v1917_v10 = vrot.slane %v1912_v59, 1 }
 0x5c5   : > { %v1914_v61 = vor.u32 %v1912_v59, %v1911_v56  ;;  %v1918_v11 = vor.u32 %v1917_v10, %v1909_v55  ;;  %v2315_v56 = vld [vmem:[#allocation3 + $0x2] sm:$0x3] }
 0x5c7   : > { %v1916_v48 = vsel %vm3922_vm5, 0, %v1914_v61  ;;  %v1920_v12 = vsel %vm3865_vm13, %v1918_v11, 0 }
 0x61b   : > { %v1930_v62 = vpop.permute.xlu2 %1929 }
 0x61c   : > { %v1944_v63 = vsel %vm1762_vm7, %v1916_v48, %v1930_v62 }
 0x61d   : > { %2290 = vmatmul.bf16.vlgmr.msrb.gmra.mxu0 %v1944_v63 }
 0x621   : > { %v2277_v17 = vpop.f32.mrf.mxu3 }
 0x629   : > { %v2279_v28 = vpop.f32.mrf.mxu3 }
 0x62b   : > { %v1922_v2 = vpop.permute.xlu1 %1921 }
 0x62c   : > { %v1933_v5 = vsel %vm1762_vm7, %v1869_v3, %v1922_v2 }
 0x62d   : > { %2248 = vmatmul.bf16.vlgmr.msra.gmra.mxu1 %v1933_v5 }
 0x633   : > { %v1925_v7 = vpop.permute.xlu1 %1924 }
 0x634   : > { %v1937_v9 = vsel %vm1762_vm7, %v1876_v8, %v1925_v7 }
 0x635   : > { %2262 = vmatmul.bf16.vlgmr.msra.gmra.mxu2 %v1937_v9 }
 0x63d   : > { %3087 = vmatmul.msk.bf16.vlgmr.msrb.gmra.mxu1 %vm1762_vm7, %v1920_v12 }
 0x69a   : > { %v2291_v20 = vpop.f32.mrf.mxu0 }
 0x6a2   : > { %v2293_v30 = vpop.f32.mrf.mxu0 }
 0x6aa   : > { %v2249_v13 = vpop.f32.mrf.mxu1 }
 0x6ab   : > { %v2250_v16 = vadd.f32 %v3307_v15, %v2249_v13 }
 0x6b2   : > { %v2251_v14 = vpop.f32.mrf.mxu1 }
 0x6b3   : > { %v2252_v57 = vadd.f32 %v3307_v15, %v2251_v14 }
 0x6b8   : > { %v2263_v18 = vpop.f32.mrf.mxu2 }
 0x6b9   : > { %v2264_v19 = vadd.f32 %v2263_v18, %v2250_v16 }
 0x6ba   : > { %v2305_v22 = vpop.f32.mrf.mxu1 }
 0x6bb   : > { %v2278_v21 = vadd.f32 %v2277_v17, %v2264_v19 }
 0x6bd   : > { %v2292_v23 = vadd.f32 %v2291_v20, %v2278_v21 }
 0x6bf   : > { %v2306_v24 = vadd.f32 %v2305_v22, %v2292_v23 }
 0x6c0   : > { %v2265_v25 = vpop.f32.mrf.mxu2 }
 0x6c1   : > { %v2310_v26 = vmax.f32 %v2306_v24, 0.0  ;;  %v2266_v27 = vadd.f32 %v2265_v25, %v2252_v57 }
 0x6c2   : > { %v2307_v32 = vpop.f32.mrf.mxu1 }
 0x6c3   : > { %2312 = vst.msk [vmem:[%s3843_s26] sm:$0xff] %vm1762_vm7, %v2310_v26  ;;  %v2280_v29 = vadd.f32 %v2279_v28, %v2266_v27  ;;  %v2325_v34 = vmul.f32 %v2310_v26, %v2310_v26  ;;  %v2316_v37 = vsel %vm1762_vm7, %v2310_v26, 0.0 }
 0x6c5   : > { %v2294_v31 = vadd.f32 %v2293_v30, %v2280_v29  ;;  %v2327_v41 = vsel %vm1762_vm7, %v2325_v34, 0.0 }
 0x6c7   : > { %v2308_v33 = vadd.f32 %v2307_v32, %v2294_v31 }
 0x6c9   : > { %v2311_v35 = vmax.f32 %v2308_v33, 0.0 }
 0x6cb   : > { %2313 = vst.msk [vmem:[%s3843_s26 + $0x8] sm:$0xff] %vm1762_vm7, %v2311_v35  ;;  %v2317_v38 = vsel %vm1762_vm7, %v2311_v35, 0.0  ;;  %v2326_v39 = vmul.f32 %v2311_v35, %v2311_v35 }
 0x6cc   : > { %v2318_v40 = vadd.f32 %v2317_v38, %v2316_v37 }
 0x6cd   : > { %v2328_v42 = vsel %vm1762_vm7, %v2326_v39, 0.0 }
 0x6ce   : > { %v2319_v43 = vrot.slane %v2318_v40, 4  ;;  %v2329_v44 = vadd.f32 %v2328_v42, %v2327_v41 }
 0x6d0   : > { %v2320_v45 = vadd.f32 %v2319_v43, %v2318_v40  ;;  %v2330_v47 = vrot.slane %v2329_v44, 4 }
 0x6d2   : > { %v2321_v49 = vrot.slane %v2320_v45, 2  ;;  %v2331_v50 = vadd.f32 %v2330_v47, %v2329_v44 }
 0x6d4   : > { %v2322_v51 = vadd.f32 %v2321_v49, %v2320_v45  ;;  %v2332_v52 = vrot.slane %v2331_v50, 2 }
 0x6d6   : > { %v2323_v53 = vrot.slane %v2322_v51, 1  ;;  %v2333_v54 = vadd.f32 %v2332_v52, %v2331_v50 }
 0x6d8   : > { %v2334_v55 = vrot.slane %v2333_v54, 1  ;;  %v2324_v58 = vadd.f32 %v2323_v53, %v2322_v51 }
 0x6da   : > { %v2335_v59 = vadd.f32 %v2334_v55, %v2333_v54 }
 0x6dc   : > { %v2337_v60 = vsel %vm1866_vm3, %v2324_v58, %v2335_v59 }
 0x6dd   : > { %v2338_v61 = vadd.f32 %v2337_v60, %v2315_v56 }
 0x6df   : > { %2340 = vst.msk [vmem:[#allocation3 + $0x2] sm:$0x3] %vm2339_vm6, %v2338_v61 }
 0x6e0 PF: > { %p3088_p10 = scmp.ne.s32.totalorder %s3343_s19, 2 }
 0x6e1   : > { %s3089_s25 = sshll.u32 (!%p3088_p10), %s3339_s18, 4  ;;  %s4100_s29 = sld [smem:[#allocation9_spill]] (!%p3088_p10) }
 0x6e2   : > { %2344 = sbr.rel (%p3088_p10) target bundleno = 2106 (0x83a), region = 100  ;;  %s2346_s26 = scalar_lea.vmem (!%p3088_p10), [#allocation2], %s3089_s25 }
 0x6e3   : > { %s4101_s27 = sld [smem:[#allocation10_spill]] (!%p3088_p10) }
 0x6e7   : > { %v2360_v62 = vld [vmem:[%s4080_s14 + $0x38] sm:$0xff]  ;;  %v2359_v48 = vld [vmem:[%s4080_s14 + $0x30] sm:$0xff]  ;;  %v2358_v63 = vld [vmem:[%s4080_s14 + $0x28] sm:$0xff]  ;;  %vm2361_vm1 = vcmask 523264  }
 0x6e8   : > { %2373 = vmatpush.msra.mxu0 %v2360_v62  ;;  %v2357_v0 = vld [vmem:[%s4080_s14 + $0x20] sm:$0xff]  ;;  %v2356_v46 = vld [vmem:[%s4080_s14 + $0x18] sm:$0xff]  ;;  %v2355_v1 = vld [vmem:[%s4080_s14 + $0x10] sm:$0xff] }
 0x6e9   : > { %v2354_v36 = vld [vmem:[%s4080_s14 + $0x8] sm:$0xff]  ;;  %v2353_v2 = vld [vmem:[%s4080_s14] sm:$0xff]  ;;  %v3236_v10 = vld [vmem:[%s4079_s13 + $0x18] sm:$0xff] }
 0x6ea   : > { %2374 = vmatpush.msra.mxu0 %v2359_v48  ;;  %v2350_v3 = vld [vmem:[#allocation3 + $0x2] sm:$0x3]  ;;  %2469 = vmatpush.bf16.msra.mxu1 %v3236_v10  ;;  %v3235_v11 = vld [vmem:[%s4079_s13 + $0x10] sm:$0xff]  ;;  %v3233_v15 = vld [vmem:[%s4079_s13] sm:$0xff] }
 0x6eb   : > { %v3234_v12 = vld [vmem:[%s4079_s13 + $0x8] sm:$0xff]  ;;  %v2351_v21 = vld [vmem:[%s4100_s29] sm:$0x1] }
 0x6ec   : > { %2375 = vmatpush.msra.mxu0 %v2358_v63  ;;  %v2347_v23 = vld [vmem:[%s2346_s26] sm:$0xff]  ;;  %v2348_v57 = vld [vmem:[%s2346_s26 + $0x8] sm:$0xff] }
 0x6ed   : > { %v3310_v29 = vld [vmem:[%s4101_s27] ss:$0 sm:$0xff]  ;;  %v2480_v49 = vld [vmem:[%s3495_s24 + $0x8] sm:$0xff] }
 0x6ee   : > { %2376 = vmatpush.msra.mxu0 %v2357_v0  ;;  %2470 = vmatpush.bf16.msra.mxu1 %v3235_v11  ;;  %v2479_v44 = vld [vmem:[%s3495_s24] sm:$0xff] }
 0x6f0   : > { %2377 = vmatpush.msra.mxu0 %v2356_v46 }
 0x6f2   : > { %2378 = vmatpush.msra.mxu0 %v2355_v1  ;;  %2471 = vmatpush.bf16.msra.mxu1 %v3234_v12 }
 0x6f4   : > { %2379 = vmatpush.msra.mxu0 %v2354_v36 }
 0x6f6   : > { %2380 = vmatpush.msra.mxu0 %v2353_v2  ;;  %2472 = vmatpush.bf16.msra.mxu1 %v3233_v15 }
 0x6f7   : > { %3090 = vmatmul.msk.f32.vlgmr.msra.gmra.mxu0 %vm2361_vm1, %v2350_v3 }
 0x774   : > { %v2382_v4 = vpop.f32.mrf.mxu0 }
 0x775   : > { %v2385_v5 = vmul.f32 0.001953125, %v2382_v4 }
 0x777   : > { %v2386_v6 = vmul.f32 %v2385_v5, %v2385_v5  ;;  %v2408_v22 = vperm.slane %v2385_v5, 0 }
 0x779   : > { %v2388_v7 = vrot.slane %v2386_v6, 7  ;;  %v2409_v26 = vsub.f32 %v2347_v23, %v2408_v22  ;;  %v2410_v27 = vsub.f32 %v2348_v57, %v2408_v22 }
 0x77b   : > { %v2390_v8 = vsub.f32 %v2385_v5, %v2388_v7 }
 0x77d   : > { %v2391_v9 = vadd.f32 1e-05, %v2390_v8 }
 0x77f   : > { %3311 = vrsqrt.f32 %v2391_v9  ;;  %vm2398_vm8 = vweird.f32 %v2391_v9 }
 0x785   : > { %v3312_v13 = vpop.eup %3311 }
 0x786   : > { %v2393_v14 = vmul.f32 %v3312_v13, %v2391_v9  ;;  %vm2399_vm7 = vweird.f32 %v3312_v13 }
 0x787   : > { %vm2400_vm9 = vmor %vm2398_vm8, %vm2399_vm7 }
 0x788   : > { %v2394_v16 = vmul.f32 %v3312_v13, %v2393_v14 }
 0x78a   : > { %v2395_v17 = vmul.f32 0.5, %v2394_v16 }
 0x78c   : > { %v2396_v18 = vsub.f32 1.5, %v2395_v17 }
 0x78e   : > { %v2397_v19 = vmul.f32 %v3312_v13, %v2396_v18 }
 0x790   : > { %v2401_v20 = vsel %vm2400_vm9, %v3312_v13, %v2397_v19 }
 0x791   : > { %2403 = vst [vmem:[#allocation1] sm:$0xff] %v2401_v20 }
 0x798   : > { %v2405_v24 = vld [vmem:[#allocation1 + $0x1] ss:$9 sm:$0xff] }
 0x799   : > { %v2407_v25 = vmul.f32 %v2405_v24, %v2351_v21 }
 0x79b   : > { %v2412_v28 = vperm.slane %v2407_v25, 0 }
 0x79d   : > { %v2414_v30 = vmul.f32 %v2412_v28, %v2409_v26  ;;  %v2415_v31 = vmul.f32 %v2412_v28, %v2410_v27 }
 0x79f   : > { %v2419_v32 = vadd.f32 %v3310_v29, %v2414_v30  ;;  %v2420_v33 = vadd.f32 %v3310_v29, %v2415_v31 }
 0x7a1   : > { %v2421_v34 = vmul.f32 0.5, %v2419_v32  ;;  %v2422_v35 = vmul.f32 0.5, %v2420_v33 }
 0x7a3   : > { %3313 = vtanh.f32 %v2421_v34 }
 0x7a4   : > { %3315 = vtanh.f32 %v2422_v35 }
 0x7a9   : > { %v3314_v37 = vpop.eup %3313 }
 0x7aa   : > { %v3316_v38 = vpop.eup %3315  ;;  %v2425_v39 = vadd.f32 1.0, %v3314_v37 }
 0x7ab   : > { %v2426_v40 = vadd.f32 1.0, %v3316_v38 }
 0x7ac   : > { %v2427_v41 = vmul.f32 0.5, %v2425_v39 }
 0x7ad   : > { %v2428_v42 = vmul.f32 0.5, %v2426_v40 }
 0x7af   : > { %v2429_v43 = vpack.c.bf16 %v2428_v42, %v2427_v41 }
 0x7b1   : > { %3107 = vmatmul.msk.bf16.vlgmr.msra.gmra.mxu1 %vm2361_vm1, %v2429_v43 }
 0x82e   : > { %v2474_v45 = vpop.f32.mrf.mxu1 }
 0x82f   : > { %v2481_v47 = vmul.f32 %v2479_v44, %v2474_v45 }
 0x831   : > { %2483 = vst.msk [vmem:[%s3500_s11] sm:$0xff] %vm2361_vm1, %v2481_v47 }
 0x836   : > { %v2476_v50 = vpop.f32.mrf.mxu1 }
 0x837   : > { %v2482_v51 = vmul.f32 %v2480_v49, %v2476_v50 }
 0x839   : > { %2484 = vst.msk [vmem:[%s3500_s11 + $0x8] sm:$0xff] %vm2361_vm1, %v2482_v51 }
 0x83a PF: > { %s4102_s18 = sld [smem:[#allocation6_spill]] }
 0x83b   : > { %s4104_s19 = sld [smem:[#allocation5_spill]] }
 0x83c   : > { %s4105_s20 = sld [smem:[#allocation7_spill]] }
 0x83d   : > { %s4106_s21 = sld [smem:[#allocation8_spill]] }
 0x840   : > { %s25_s22 = sadd.s32 1, %s4102_s18   ;;  %s4103_s18 = sld [smem:[#allocation4_spill]] }
 0x841   : > { %p22_p11 = scmp.ge.s32.totalorder %s25_s22, 8  }
 0x843   :  { %24 = sbr.rel (!%p22_p11) target bundleno = 4 (0x4), region = 144 }

</bundles_post_ra>
